<compile_context>
chip_gen: v5e
topology: v5e:2x2
jax: 0.10.0
libtpu: 0.0.40
codegen_flags: <defaults>
</compile_context>

<pallas_src>
import jax
import jax.numpy as jnp
from jax.experimental import pallas as pl
from jax.experimental.pallas import tpu as pltpu  # noqa: F401


def _round_up(x, m):
    return ((x + m - 1) // m) * m


# ---------------------------------------------------------------------------
# Fused kernel: GRU recurrence (in-kernel unrolled loop) + attention tail.
# All arrays are whole-array VMEM residents (no grid).
# ---------------------------------------------------------------------------
def _question_fused_kernel(qlen_ref, vlen_ref,
                           gates_i_ref,      # (T, Bp, 3Hp)  x@Wi + b_ih, time-major
                           wh_ref,           # (Hp, 3Hp)     fused [Whr|Whz|Whn]^T
                           bh_ref,           # (1, 3Hp)      fused b_hh
                           ctx_ref,          # (Bp, Tv, Hp)  video features
                           w_mix_ref, w_hid_ref, b_out_ref,
                           out_ref,          # (T, Bp, Hp)   GRU outputs (time-major)
                           hid_ref,          # (Bp, Hp)      final hidden
                           q_ref,            # (Bp, Hp)      attended question vector
                           attn_ref):        # (Bp, Tv)      attention weights
    T, Bp, _ = gates_i_ref.shape
    Hp = wh_ref.shape[0]

    wh = wh_ref[...]
    bh = bh_ref[...]
    qlen = qlen_ref[...]                      # (Bp, 1) int32

    def step(t, h):
        gi = gates_i_ref[t]                   # (Bp, 3Hp) precomputed input gates
        gh = jnp.dot(h, wh, preferred_element_type=jnp.float32) + bh
        r = jax.nn.sigmoid(gi[:, :Hp] + gh[:, :Hp])
        z = jax.nn.sigmoid(gi[:, Hp:2 * Hp] + gh[:, Hp:2 * Hp])
        n = jnp.tanh(gi[:, 2 * Hp:] + r * gh[:, 2 * Hp:])
        h_new = (1.0 - z) * n + z * h

        valid = qlen > t                      # (Bp, 1) mask: inside sequence?
        out_ref[t] = jnp.where(valid, h_new, jnp.zeros_like(h_new))
        return jnp.where(valid, h_new, h)     # freeze hidden past seq end

    h0 = jnp.zeros((Bp, Hp), jnp.float32)
    h = jax.lax.fori_loop(0, T, step, h0, unroll=True)
    hid_ref[...] = h

    # ---- fused attention over the video context ---------------------------
    ctx = ctx_ref[...]                                               # (Bp, Tv, Hp)
    scores = jnp.einsum("bqh,bkh->bqk", h[:, None, :], ctx,
                        preferred_element_type=jnp.float32)[:, 0, :]  # (Bp, Tv)

    pos = jax.lax.broadcasted_iota(jnp.int32, scores.shape, 1)
    scores = jnp.where(pos < vlen_ref[...], scores, jnp.float32(-1e30))

    m = jnp.max(scores, axis=-1, keepdims=True)
    e = jnp.exp(scores - m)
    denom = jnp.sum(e, axis=-1, keepdims=True)
    attn = e * pl.reciprocal(denom, approx=True)                     # EUP recip
    attn_ref[...] = attn

    mix = jnp.einsum("bqk,bkh->bqh", attn[:, None, :], ctx,
                     preferred_element_type=jnp.float32)[:, 0, :]    # (Bp, Hp)

    q_ref[...] = jnp.tanh(
        jnp.dot(mix, w_mix_ref[...], preferred_element_type=jnp.float32)
        + jnp.dot(h, w_hid_ref[...], preferred_element_type=jnp.float32)
        + b_out_ref[...])


# ---------------------------------------------------------------------------
# Parameter init: PyTorch-like shapes, then fused + lane-padded for the kernel.
# ---------------------------------------------------------------------------
def init_params(key, vocab_nums, vocab_size, hidden_size):
    E, H = vocab_size, hidden_size
    Hp = _round_up(H, 128)
    ks = jax.random.split(key, 7)
    k = H ** -0.5
    k2 = (2 * H) ** -0.5

    embedding = jax.random.normal(ks[0], (vocab_nums, E), jnp.float32)
    w_ih = jax.random.uniform(ks[1], (3 * H, E), jnp.float32, -k, k)   # [r; z; n]
    w_hh = jax.random.uniform(ks[2], (3 * H, H), jnp.float32, -k, k)
    b_ih = jax.random.uniform(ks[3], (3 * H,), jnp.float32, -k, k)
    b_hh = jax.random.uniform(ks[4], (3 * H,), jnp.float32, -k, k)
    w_out = jax.random.uniform(ks[5], (H, 2 * H), jnp.float32, -k2, k2)
    b_out = jax.random.uniform(ks[6], (H,), jnp.float32, -k2, k2)

    # Fused + zero-padded gate weights.  Gate g occupies lanes [g*Hp, g*Hp+H);
    # zero padding keeps the padded hidden lanes identically 0 through the
    # recurrence (h0 = 0  =>  padded h_new = 0.5*0 + 0.5*0 = 0).
    wi = jnp.zeros((E, 3 * Hp), jnp.float32)
    wh = jnp.zeros((Hp, 3 * Hp), jnp.float32)
    bi = jnp.zeros((1, 3 * Hp), jnp.float32)
    bh = jnp.zeros((1, 3 * Hp), jnp.float32)
    for g in range(3):
        wi = wi.at[:, g * Hp:g * Hp + H].set(w_ih[g * H:(g + 1) * H, :].T)
        wh = wh.at[:H, g * Hp:g * Hp + H].set(w_hh[g * H:(g + 1) * H, :].T)
        bi = bi.at[0, g * Hp:g * Hp + H].set(b_ih[g * H:(g + 1) * H])
        bh = bh.at[0, g * Hp:g * Hp + H].set(b_hh[g * H:(g + 1) * H])

    w_mix = jnp.zeros((Hp, Hp), jnp.float32).at[:H, :H].set(w_out[:, :H].T)
    w_hid = jnp.zeros((Hp, Hp), jnp.float32).at[:H, :H].set(w_out[:, H:].T)
    b_out_p = jnp.zeros((1, Hp), jnp.float32).at[0, :H].set(b_out)

    return dict(embedding=embedding, wi=wi, wh=wh, bi=bi, bh=bh,
                w_mix=w_mix, w_hid=w_hid, b_out=b_out_p)


# ---------------------------------------------------------------------------
# Forward pass (fully jittable: no host syncs).
# ---------------------------------------------------------------------------
def question_model_forward(params, video_features, video_length,
                           questions, question_length):
    B, Tq = questions.shape
    Tv, H = video_features.shape[1], video_features.shape[2]
    Hp = params["wh"].shape[0]
    Bp = _round_up(B, 8)
    pad_b = Bp - B

    questions = questions.astype(jnp.int32)
    word_embed = jnp.take(params["embedding"], questions, axis=0)    # (B, Tq, E)
    # nn.Dropout: identity in eval mode.

    emb_p = jnp.pad(word_embed, ((0, pad_b), (0, 0), (0, 0)))
    qlen_p = jnp.pad(question_length.astype(jnp.int32), (0, pad_b)).reshape(Bp, 1)
    vlen_p = jnp.pad(video_length.astype(jnp.int32), (0, pad_b)).reshape(Bp, 1)
    ctx_p = jnp.pad(video_features.astype(jnp.float32),
                    ((0, pad_b), (0, 0), (0, Hp - H)))

    # Hoisted input projection: one big GEMM for all T steps, produced directly
    # time-major so the recurrent kernel indexes its leading dim (no explicit
    # transpose op in the wrapper).
    gates_i = jnp.einsum("bte,eg->tbg", emb_p, params["wi"],
                         preferred_element_type=jnp.float32) + params["bi"]

    out_shape = [
        jax.ShapeDtypeStruct((Tq, Bp, Hp), jnp.float32),   # GRU outputs (time-major)
        jax.ShapeDtypeStruct((Bp, Hp), jnp.float32),       # final hidden
        jax.ShapeDtypeStruct((Bp, Hp), jnp.float32),       # attended question vector
        jax.ShapeDtypeStruct((Bp, Tv), jnp.float32),       # attention weights
    ]
    outputs_tm, hidden_p, q_p, attn_p = pl.pallas_call(
        _question_fused_kernel, out_shape=out_shape,
    )(qlen_p, vlen_p, gates_i, params["wh"], params["bh"], ctx_p,
      params["w_mix"], params["w_hid"], params["b_out"])

    # Final relayout/slice back to PyTorch's batch-first, unpadded shapes.
    # (Writing batch-first blocks from the kernel would need a sub-(8,·)
    #  second-minor output block; this ~8 KB XLA relayout is cheaper/safer.)
    # Note: outputs keep the full Tq axis (zeros past each length) instead of
    # trimming to max(question_length) — avoids a device->host sync.
    outputs = jnp.transpose(outputs_tm, (1, 0, 2))[:B, :, :H]        # (B, Tq, H)
    hidden = hidden_p[:B, :H][:, None, :]                            # (B, 1, H)
    q = q_p[:B, :H][:, None, :]                                      # (B, 1, H)
    attn_scores = attn_p[:B][:, None, :]                             # (B, 1, Tv)
    return q, attn_scores, hidden, outputs


if __name__ == "__main__":
    key = jax.random.PRNGKey(0)
    vocab_nums, vocab_size, hidden_size = 50, 32, 32   # E = vocab_size (emb dim)
    B, Tq, Tv = 2, 8, 16

    kp, kv, kq = jax.random.split(key, 3)
    params = init_params(kp, vocab_nums, vocab_size, hidden_size)

    video_features = jax.random.normal(kv, (B, Tv, hidden_size), jnp.float32)
    video_length = jnp.array([16, 10], dtype=jnp.int32)
    questions = jax.random.randint(kq, (B, Tq), 0, vocab_nums)
    question_length = jnp.array([8, 5], dtype=jnp.int32)

    fwd = jax.jit(question_model_forward)
    q, attn_scores, hidden, outputs = fwd(
        params, video_features, video_length, questions, question_length)
    jax.block_until_ready((q, attn_scores, hidden, outputs))

    assert q.shape == (B, 1, hidden_size)
    assert attn_scores.shape == (B, 1, Tv)
    assert hidden.shape == (B, 1, hidden_size)
    assert outputs.shape == (B, Tq, hidden_size)
    assert bool(jnp.all(jnp.isfinite(q))) and bool(jnp.all(jnp.isfinite(outputs)))
    print("KERNEL_OK")
</pallas_src>

<mosaic_0001>
module attributes {stable_mosaic.version = 11 : i64} {
  func.func @_question_fused_kernel(%arg0: memref<8x1xi32, #tpu.memory_space<vmem>>, %arg1: memref<8x1xi32, #tpu.memory_space<vmem>>, %arg2: memref<8x8x384xf32, #tpu.memory_space<vmem>>, %arg3: memref<128x384xf32, #tpu.memory_space<vmem>>, %arg4: memref<1x384xf32, #tpu.memory_space<vmem>>, %arg5: memref<8x16x128xf32, #tpu.memory_space<vmem>>, %arg6: memref<128x128xf32, #tpu.memory_space<vmem>>, %arg7: memref<128x128xf32, #tpu.memory_space<vmem>>, %arg8: memref<1x128xf32, #tpu.memory_space<vmem>>, %arg9: memref<8x8x128xf32, #tpu.memory_space<vmem>>, %arg10: memref<8x128xf32, #tpu.memory_space<vmem>>, %arg11: memref<8x128xf32, #tpu.memory_space<vmem>>, %arg12: memref<8x16xf32, #tpu.memory_space<vmem>>) attributes {dimension_semantics = [], scalar_prefetch = 0 : i64, scratch_operands = 0 : i64, tpu.core_type = #tpu.core_type<tc>} {
    %c0 = arith.constant 0 : index
    %c0_0 = arith.constant 0 : index
    %0 = vector.load %arg3[%c0, %c0_0] : memref<128x384xf32, #tpu.memory_space<vmem>>, vector<128x384xf32>
    %c0_1 = arith.constant 0 : index
    %c0_2 = arith.constant 0 : index
    %1 = vector.load %arg4[%c0_1, %c0_2] : memref<1x384xf32, #tpu.memory_space<vmem>>, vector<1x384xf32>
    %c0_3 = arith.constant 0 : index
    %c0_4 = arith.constant 0 : index
    %2 = vector.load %arg0[%c0_3, %c0_4] : memref<8x1xi32, #tpu.memory_space<vmem>>, vector<8x1xi32>
    %cst = arith.constant 0.000000e+00 : f32
    %3 = vector.broadcast %cst : f32 to vector<8x128xf32>
    %c0_i32 = arith.constant 0 : i32
    %4 = arith.index_cast %c0_i32 : i32 to index
    %c0_5 = arith.constant 0 : index
    %c0_6 = arith.constant 0 : index
    %5 = vector.load %arg2[%4, %c0_5, %c0_6] : memref<8x8x384xf32, #tpu.memory_space<vmem>>, vector<1x8x384xf32>
    %6 = vector.shape_cast %5 : vector<1x8x384xf32> to vector<8x384xf32>
    %cst_7 = arith.constant dense<0.000000e+00> : vector<8x384xf32>
    %7 = tpu.matmul %3, %0, %cst_7 {dimension_numbers = #tpu.dot_dimension_numbers<[1], [0], [0], [1], [0, 0, 1, 1], [], []>} : vector<8x128xf32>, vector<128x384xf32>, vector<8x384xf32> -> vector<8x384xf32>
    %8 = vector.broadcast %1 : vector<1x384xf32> to vector<8x384xf32>
    %9 = arith.addf %7, %8 : vector<8x384xf32>
    %10 = vector.extract_strided_slice %6 {offsets = [0, 0], sizes = [8, 128], strides = [1, 1]} : vector<8x384xf32> to vector<8x128xf32>
    %11 = vector.extract_strided_slice %9 {offsets = [0, 0], sizes = [8, 128], strides = [1, 1]} : vector<8x384xf32> to vector<8x128xf32>
    %12 = arith.addf %10, %11 : vector<8x128xf32>
    %13 = arith.negf %12 : vector<8x128xf32>
    %14 = math.exp %13 : vector<8x128xf32>
    %cst_8 = arith.constant 1.000000e+00 : f32
    %15 = vector.broadcast %cst_8 : f32 to vector<8x128xf32>
    %16 = arith.addf %15, %14 : vector<8x128xf32>
    %17 = arith.divf %15, %16 : vector<8x128xf32>
    %18 = vector.extract_strided_slice %6 {offsets = [0, 128], sizes = [8, 128], strides = [1, 1]} : vector<8x384xf32> to vector<8x128xf32>
    %19 = vector.extract_strided_slice %9 {offsets = [0, 128], sizes = [8, 128], strides = [1, 1]} : vector<8x384xf32> to vector<8x128xf32>
    %20 = arith.addf %18, %19 : vector<8x128xf32>
    %21 = arith.negf %20 : vector<8x128xf32>
    %22 = math.exp %21 : vector<8x128xf32>
    %cst_9 = arith.constant 1.000000e+00 : f32
    %23 = vector.broadcast %cst_9 : f32 to vector<8x128xf32>
    %24 = arith.addf %23, %22 : vector<8x128xf32>
    %25 = arith.divf %23, %24 : vector<8x128xf32>
    %26 = vector.extract_strided_slice %6 {offsets = [0, 256], sizes = [8, 128], strides = [1, 1]} : vector<8x384xf32> to vector<8x128xf32>
    %27 = vector.extract_strided_slice %9 {offsets = [0, 256], sizes = [8, 128], strides = [1, 1]} : vector<8x384xf32> to vector<8x128xf32>
    %28 = arith.mulf %17, %27 : vector<8x128xf32>
    %29 = arith.addf %26, %28 : vector<8x128xf32>
    %30 = math.tanh %29 : vector<8x128xf32>
    %cst_10 = arith.constant 1.000000e+00 : f32
    %31 = vector.broadcast %cst_10 : f32 to vector<8x128xf32>
    %32 = arith.subf %31, %25 : vector<8x128xf32>
    %33 = arith.mulf %32, %30 : vector<8x128xf32>
    %34 = arith.mulf %25, %3 : vector<8x128xf32>
    %35 = arith.addf %33, %34 : vector<8x128xf32>
    %36 = vector.broadcast %c0_i32 : i32 to vector<8x1xi32>
    %37 = arith.cmpi sgt, %2, %36 : vector<8x1xi32>
    %cst_11 = arith.constant 0.000000e+00 : f32
    %38 = vector.broadcast %cst_11 : f32 to vector<8x128xf32>
    %39 = vector.shape_cast %37 : vector<8x1xi1> to vector<8x1xi1>
    %40 = vector.broadcast %39 : vector<8x1xi1> to vector<8x128xi1>
    %41 = arith.select %40, %35, %38 : vector<8x128xi1>, vector<8x128xf32>
    %42 = arith.index_cast %c0_i32 : i32 to index
    %c0_12 = arith.constant 0 : index
    %c0_13 = arith.constant 0 : index
    %43 = vector.load %arg9[%42, %c0_12, %c0_13] : memref<8x8x128xf32, #tpu.memory_space<vmem>>, vector<1x8x128xf32>
    %44 = vector.shape_cast %43 : vector<1x8x128xf32> to vector<8x128xf32>
    %45 = vector.shape_cast %41 : vector<8x128xf32> to vector<1x8x128xf32>
    tpu.vector_store %arg9[%42, %c0_12, %c0_13], %45 {strides = array<i32>} : memref<8x8x128xf32, #tpu.memory_space<vmem>>, vector<1x8x128xf32>,
    %46 = vector.shape_cast %37 : vector<8x1xi1> to vector<8x1xi1>
    %47 = vector.broadcast %46 : vector<8x1xi1> to vector<8x128xi1>
    %48 = arith.select %47, %35, %3 : vector<8x128xi1>, vector<8x128xf32>
    %c1_i32 = arith.constant 1 : i32
    %49 = arith.index_cast %c1_i32 : i32 to index
    %c0_14 = arith.constant 0 : index
    %c0_15 = arith.constant 0 : index
    %50 = vector.load %arg2[%49, %c0_14, %c0_15] : memref<8x8x384xf32, #tpu.memory_space<vmem>>, vector<1x8x384xf32>
    %51 = vector.shape_cast %50 : vector<1x8x384xf32> to vector<8x384xf32>
    %cst_16 = arith.constant dense<0.000000e+00> : vector<8x384xf32>
    %52 = tpu.matmul %48, %0, %cst_16 {dimension_numbers = #tpu.dot_dimension_numbers<[1], [0], [0], [1], [0, 0, 1, 1], [], []>} : vector<8x128xf32>, vector<128x384xf32>, vector<8x384xf32> -> vector<8x384xf32>
    %53 = vector.broadcast %1 : vector<1x384xf32> to vector<8x384xf32>
    %54 = arith.addf %52, %53 : vector<8x384xf32>
    %55 = vector.extract_strided_slice %51 {offsets = [0, 0], sizes = [8, 128], strides = [1, 1]} : vector<8x384xf32> to vector<8x128xf32>
    %56 = vector.extract_strided_slice %54 {offsets = [0, 0], sizes = [8, 128], strides = [1, 1]} : vector<8x384xf32> to vector<8x128xf32>
    %57 = arith.addf %55, %56 : vector<8x128xf32>
    %58 = arith.negf %57 : vector<8x128xf32>
    %59 = math.exp %58 : vector<8x128xf32>
    %cst_17 = arith.constant 1.000000e+00 : f32
    %60 = vector.broadcast %cst_17 : f32 to vector<8x128xf32>
    %61 = arith.addf %60, %59 : vector<8x128xf32>
    %62 = arith.divf %60, %61 : vector<8x128xf32>
    %63 = vector.extract_strided_slice %51 {offsets = [0, 128], sizes = [8, 128], strides = [1, 1]} : vector<8x384xf32> to vector<8x128xf32>
    %64 = vector.extract_strided_slice %54 {offsets = [0, 128], sizes = [8, 128], strides = [1, 1]} : vector<8x384xf32> to vector<8x128xf32>
    %65 = arith.addf %63, %64 : vector<8x128xf32>
    %66 = arith.negf %65 : vector<8x128xf32>
    %67 = math.exp %66 : vector<8x128xf32>
    %cst_18 = arith.constant 1.000000e+00 : f32
    %68 = vector.broadcast %cst_18 : f32 to vector<8x128xf32>
    %69 = arith.addf %68, %67 : vector<8x128xf32>
    %70 = arith.divf %68, %69 : vector<8x128xf32>
    %71 = vector.extract_strided_slice %51 {offsets = [0, 256], sizes = [8, 128], strides = [1, 1]} : vector<8x384xf32> to vector<8x128xf32>
    %72 = vector.extract_strided_slice %54 {offsets = [0, 256], sizes = [8, 128], strides = [1, 1]} : vector<8x384xf32> to vector<8x128xf32>
    %73 = arith.mulf %62, %72 : vector<8x128xf32>
    %74 = arith.addf %71, %73 : vector<8x128xf32>
    %75 = math.tanh %74 : vector<8x128xf32>
    %cst_19 = arith.constant 1.000000e+00 : f32
    %76 = vector.broadcast %cst_19 : f32 to vector<8x128xf32>
    %77 = arith.subf %76, %70 : vector<8x128xf32>
    %78 = arith.mulf %77, %75 : vector<8x128xf32>
    %79 = arith.mulf %70, %48 : vector<8x128xf32>
    %80 = arith.addf %78, %79 : vector<8x128xf32>
    %81 = vector.broadcast %c1_i32 : i32 to vector<8x1xi32>
    %82 = arith.cmpi sgt, %2, %81 : vector<8x1xi32>
    %cst_20 = arith.constant 0.000000e+00 : f32
    %83 = vector.broadcast %cst_20 : f32 to vector<8x128xf32>
    %84 = vector.shape_cast %82 : vector<8x1xi1> to vector<8x1xi1>
    %85 = vector.broadcast %84 : vector<8x1xi1> to vector<8x128xi1>
    %86 = arith.select %85, %80, %83 : vector<8x128xi1>, vector<8x128xf32>
    %87 = arith.index_cast %c1_i32 : i32 to index
    %c0_21 = arith.constant 0 : index
    %c0_22 = arith.constant 0 : index
    %88 = vector.load %arg9[%87, %c0_21, %c0_22] : memref<8x8x128xf32, #tpu.memory_space<vmem>>, vector<1x8x128xf32>
    %89 = vector.shape_cast %88 : vector<1x8x128xf32> to vector<8x128xf32>
    %90 = vector.shape_cast %86 : vector<8x128xf32> to vector<1x8x128xf32>
    tpu.vector_store %arg9[%87, %c0_21, %c0_22], %90 {strides = array<i32>} : memref<8x8x128xf32, #tpu.memory_space<vmem>>, vector<1x8x128xf32>,
    %91 = vector.shape_cast %82 : vector<8x1xi1> to vector<8x1xi1>
    %92 = vector.broadcast %91 : vector<8x1xi1> to vector<8x128xi1>
    %93 = arith.select %92, %80, %48 : vector<8x128xi1>, vector<8x128xf32>
    %c2_i32 = arith.constant 2 : i32
    %94 = arith.index_cast %c2_i32 : i32 to index
    %c0_23 = arith.constant 0 : index
    %c0_24 = arith.constant 0 : index
    %95 = vector.load %arg2[%94, %c0_23, %c0_24] : memref<8x8x384xf32, #tpu.memory_space<vmem>>, vector<1x8x384xf32>
    %96 = vector.shape_cast %95 : vector<1x8x384xf32> to vector<8x384xf32>
    %cst_25 = arith.constant dense<0.000000e+00> : vector<8x384xf32>
    %97 = tpu.matmul %93, %0, %cst_25 {dimension_numbers = #tpu.dot_dimension_numbers<[1], [0], [0], [1], [0, 0, 1, 1], [], []>} : vector<8x128xf32>, vector<128x384xf32>, vector<8x384xf32> -> vector<8x384xf32>
    %98 = vector.broadcast %1 : vector<1x384xf32> to vector<8x384xf32>
    %99 = arith.addf %97, %98 : vector<8x384xf32>
    %100 = vector.extract_strided_slice %96 {offsets = [0, 0], sizes = [8, 128], strides = [1, 1]} : vector<8x384xf32> to vector<8x128xf32>
    %101 = vector.extract_strided_slice %99 {offsets = [0, 0], sizes = [8, 128], strides = [1, 1]} : vector<8x384xf32> to vector<8x128xf32>
    %102 = arith.addf %100, %101 : vector<8x128xf32>
    %103 = arith.negf %102 : vector<8x128xf32>
    %104 = math.exp %103 : vector<8x128xf32>
    %cst_26 = arith.constant 1.000000e+00 : f32
    %105 = vector.broadcast %cst_26 : f32 to vector<8x128xf32>
    %106 = arith.addf %105, %104 : vector<8x128xf32>
    %107 = arith.divf %105, %106 : vector<8x128xf32>
    %108 = vector.extract_strided_slice %96 {offsets = [0, 128], sizes = [8, 128], strides = [1, 1]} : vector<8x384xf32> to vector<8x128xf32>
    %109 = vector.extract_strided_slice %99 {offsets = [0, 128], sizes = [8, 128], strides = [1, 1]} : vector<8x384xf32> to vector<8x128xf32>
    %110 = arith.addf %108, %109 : vector<8x128xf32>
    %111 = arith.negf %110 : vector<8x128xf32>
    %112 = math.exp %111 : vector<8x128xf32>
    %cst_27 = arith.constant 1.000000e+00 : f32
    %113 = vector.broadcast %cst_27 : f32 to vector<8x128xf32>
    %114 = arith.addf %113, %112 : vector<8x128xf32>
    %115 = arith.divf %113, %114 : vector<8x128xf32>
    %116 = vector.extract_strided_slice %96 {offsets = [0, 256], sizes = [8, 128], strides = [1, 1]} : vector<8x384xf32> to vector<8x128xf32>
    %117 = vector.extract_strided_slice %99 {offsets = [0, 256], sizes = [8, 128], strides = [1, 1]} : vector<8x384xf32> to vector<8x128xf32>
    %118 = arith.mulf %107, %117 : vector<8x128xf32>
    %119 = arith.addf %116, %118 : vector<8x128xf32>
    %120 = math.tanh %119 : vector<8x128xf32>
    %cst_28 = arith.constant 1.000000e+00 : f32
    %121 = vector.broadcast %cst_28 : f32 to vector<8x128xf32>
    %122 = arith.subf %121, %115 : vector<8x128xf32>
    %123 = arith.mulf %122, %120 : vector<8x128xf32>
    %124 = arith.mulf %115, %93 : vector<8x128xf32>
    %125 = arith.addf %123, %124 : vector<8x128xf32>
    %126 = vector.broadcast %c2_i32 : i32 to vector<8x1xi32>
    %127 = arith.cmpi sgt, %2, %126 : vector<8x1xi32>
    %cst_29 = arith.constant 0.000000e+00 : f32
    %128 = vector.broadcast %cst_29 : f32 to vector<8x128xf32>
    %129 = vector.shape_cast %127 : vector<8x1xi1> to vector<8x1xi1>
    %130 = vector.broadcast %129 : vector<8x1xi1> to vector<8x128xi1>
    %131 = arith.select %130, %125, %128 : vector<8x128xi1>, vector<8x128xf32>
    %132 = arith.index_cast %c2_i32 : i32 to index
    %c0_30 = arith.constant 0 : index
    %c0_31 = arith.constant 0 : index
    %133 = vector.load %arg9[%132, %c0_30, %c0_31] : memref<8x8x128xf32, #tpu.memory_space<vmem>>, vector<1x8x128xf32>
    %134 = vector.shape_cast %133 : vector<1x8x128xf32> to vector<8x128xf32>
    %135 = vector.shape_cast %131 : vector<8x128xf32> to vector<1x8x128xf32>
    tpu.vector_store %arg9[%132, %c0_30, %c0_31], %135 {strides = array<i32>} : memref<8x8x128xf32, #tpu.memory_space<vmem>>, vector<1x8x128xf32>,
    %136 = vector.shape_cast %127 : vector<8x1xi1> to vector<8x1xi1>
    %137 = vector.broadcast %136 : vector<8x1xi1> to vector<8x128xi1>
    %138 = arith.select %137, %125, %93 : vector<8x128xi1>, vector<8x128xf32>
    %c3_i32 = arith.constant 3 : i32
    %139 = arith.index_cast %c3_i32 : i32 to index
    %c0_32 = arith.constant 0 : index
    %c0_33 = arith.constant 0 : index
    %140 = vector.load %arg2[%139, %c0_32, %c0_33] : memref<8x8x384xf32, #tpu.memory_space<vmem>>, vector<1x8x384xf32>
    %141 = vector.shape_cast %140 : vector<1x8x384xf32> to vector<8x384xf32>
    %cst_34 = arith.constant dense<0.000000e+00> : vector<8x384xf32>
    %142 = tpu.matmul %138, %0, %cst_34 {dimension_numbers = #tpu.dot_dimension_numbers<[1], [0], [0], [1], [0, 0, 1, 1], [], []>} : vector<8x128xf32>, vector<128x384xf32>, vector<8x384xf32> -> vector<8x384xf32>
    %143 = vector.broadcast %1 : vector<1x384xf32> to vector<8x384xf32>
    %144 = arith.addf %142, %143 : vector<8x384xf32>
    %145 = vector.extract_strided_slice %141 {offsets = [0, 0], sizes = [8, 128], strides = [1, 1]} : vector<8x384xf32> to vector<8x128xf32>
    %146 = vector.extract_strided_slice %144 {offsets = [0, 0], sizes = [8, 128], strides = [1, 1]} : vector<8x384xf32> to vector<8x128xf32>
    %147 = arith.addf %145, %146 : vector<8x128xf32>
    %148 = arith.negf %147 : vector<8x128xf32>
    %149 = math.exp %148 : vector<8x128xf32>
    %cst_35 = arith.constant 1.000000e+00 : f32
    %150 = vector.broadcast %cst_35 : f32 to vector<8x128xf32>
    %151 = arith.addf %150, %149 : vector<8x128xf32>
    %152 = arith.divf %150, %151 : vector<8x128xf32>
    %153 = vector.extract_strided_slice %141 {offsets = [0, 128], sizes = [8, 128], strides = [1, 1]} : vector<8x384xf32> to vector<8x128xf32>
    %154 = vector.extract_strided_slice %144 {offsets = [0, 128], sizes = [8, 128], strides = [1, 1]} : vector<8x384xf32> to vector<8x128xf32>
    %155 = arith.addf %153, %154 : vector<8x128xf32>
    %156 = arith.negf %155 : vector<8x128xf32>
    %157 = math.exp %156 : vector<8x128xf32>
    %cst_36 = arith.constant 1.000000e+00 : f32
    %158 = vector.broadcast %cst_36 : f32 to vector<8x128xf32>
    %159 = arith.addf %158, %157 : vector<8x128xf32>
    %160 = arith.divf %158, %159 : vector<8x128xf32>
    %161 = vector.extract_strided_slice %141 {offsets = [0, 256], sizes = [8, 128], strides = [1, 1]} : vector<8x384xf32> to vector<8x128xf32>
    %162 = vector.extract_strided_slice %144 {offsets = [0, 256], sizes = [8, 128], strides = [1, 1]} : vector<8x384xf32> to vector<8x128xf32>
    %163 = arith.mulf %152, %162 : vector<8x128xf32>
    %164 = arith.addf %161, %163 : vector<8x128xf32>
    %165 = math.tanh %164 : vector<8x128xf32>
    %cst_37 = arith.constant 1.000000e+00 : f32
    %166 = vector.broadcast %cst_37 : f32 to vector<8x128xf32>
    %167 = arith.subf %166, %160 : vector<8x128xf32>
    %168 = arith.mulf %167, %165 : vector<8x128xf32>
    %169 = arith.mulf %160, %138 : vector<8x128xf32>
    %170 = arith.addf %168, %169 : vector<8x128xf32>
    %171 = vector.broadcast %c3_i32 : i32 to vector<8x1xi32>
    %172 = arith.cmpi sgt, %2, %171 : vector<8x1xi32>
    %cst_38 = arith.constant 0.000000e+00 : f32
    %173 = vector.broadcast %cst_38 : f32 to vector<8x128xf32>
    %174 = vector.shape_cast %172 : vector<8x1xi1> to vector<8x1xi1>
    %175 = vector.broadcast %174 : vector<8x1xi1> to vector<8x128xi1>
    %176 = arith.select %175, %170, %173 : vector<8x128xi1>, vector<8x128xf32>
    %177 = arith.index_cast %c3_i32 : i32 to index
    %c0_39 = arith.constant 0 : index
    %c0_40 = arith.constant 0 : index
    %178 = vector.load %arg9[%177, %c0_39, %c0_40] : memref<8x8x128xf32, #tpu.memory_space<vmem>>, vector<1x8x128xf32>
    %179 = vector.shape_cast %178 : vector<1x8x128xf32> to vector<8x128xf32>
    %180 = vector.shape_cast %176 : vector<8x128xf32> to vector<1x8x128xf32>
    tpu.vector_store %arg9[%177, %c0_39, %c0_40], %180 {strides = array<i32>} : memref<8x8x128xf32, #tpu.memory_space<vmem>>, vector<1x8x128xf32>,
    %181 = vector.shape_cast %172 : vector<8x1xi1> to vector<8x1xi1>
    %182 = vector.broadcast %181 : vector<8x1xi1> to vector<8x128xi1>
    %183 = arith.select %182, %170, %138 : vector<8x128xi1>, vector<8x128xf32>
    %c4_i32 = arith.constant 4 : i32
    %184 = arith.index_cast %c4_i32 : i32 to index
    %c0_41 = arith.constant 0 : index
    %c0_42 = arith.constant 0 : index
    %185 = vector.load %arg2[%184, %c0_41, %c0_42] : memref<8x8x384xf32, #tpu.memory_space<vmem>>, vector<1x8x384xf32>
    %186 = vector.shape_cast %185 : vector<1x8x384xf32> to vector<8x384xf32>
    %cst_43 = arith.constant dense<0.000000e+00> : vector<8x384xf32>
    %187 = tpu.matmul %183, %0, %cst_43 {dimension_numbers = #tpu.dot_dimension_numbers<[1], [0], [0], [1], [0, 0, 1, 1], [], []>} : vector<8x128xf32>, vector<128x384xf32>, vector<8x384xf32> -> vector<8x384xf32>
    %188 = vector.broadcast %1 : vector<1x384xf32> to vector<8x384xf32>
    %189 = arith.addf %187, %188 : vector<8x384xf32>
    %190 = vector.extract_strided_slice %186 {offsets = [0, 0], sizes = [8, 128], strides = [1, 1]} : vector<8x384xf32> to vector<8x128xf32>
    %191 = vector.extract_strided_slice %189 {offsets = [0, 0], sizes = [8, 128], strides = [1, 1]} : vector<8x384xf32> to vector<8x128xf32>
    %192 = arith.addf %190, %191 : vector<8x128xf32>
    %193 = arith.negf %192 : vector<8x128xf32>
    %194 = math.exp %193 : vector<8x128xf32>
    %cst_44 = arith.constant 1.000000e+00 : f32
    %195 = vector.broadcast %cst_44 : f32 to vector<8x128xf32>
    %196 = arith.addf %195, %194 : vector<8x128xf32>
    %197 = arith.divf %195, %196 : vector<8x128xf32>
    %198 = vector.extract_strided_slice %186 {offsets = [0, 128], sizes = [8, 128], strides = [1, 1]} : vector<8x384xf32> to vector<8x128xf32>
    %199 = vector.extract_strided_slice %189 {offsets = [0, 128], sizes = [8, 128], strides = [1, 1]} : vector<8x384xf32> to vector<8x128xf32>
    %200 = arith.addf %198, %199 : vector<8x128xf32>
    %201 = arith.negf %200 : vector<8x128xf32>
    %202 = math.exp %201 : vector<8x128xf32>
    %cst_45 = arith.constant 1.000000e+00 : f32
    %203 = vector.broadcast %cst_45 : f32 to vector<8x128xf32>
    %204 = arith.addf %203, %202 : vector<8x128xf32>
    %205 = arith.divf %203, %204 : vector<8x128xf32>
    %206 = vector.extract_strided_slice %186 {offsets = [0, 256], sizes = [8, 128], strides = [1, 1]} : vector<8x384xf32> to vector<8x128xf32>
    %207 = vector.extract_strided_slice %189 {offsets = [0, 256], sizes = [8, 128], strides = [1, 1]} : vector<8x384xf32> to vector<8x128xf32>
    %208 = arith.mulf %197, %207 : vector<8x128xf32>
    %209 = arith.addf %206, %208 : vector<8x128xf32>
    %210 = math.tanh %209 : vector<8x128xf32>
    %cst_46 = arith.constant 1.000000e+00 : f32
    %211 = vector.broadcast %cst_46 : f32 to vector<8x128xf32>
    %212 = arith.subf %211, %205 : vector<8x128xf32>
    %213 = arith.mulf %212, %210 : vector<8x128xf32>
    %214 = arith.mulf %205, %183 : vector<8x128xf32>
    %215 = arith.addf %213, %214 : vector<8x128xf32>
    %216 = vector.broadcast %c4_i32 : i32 to vector<8x1xi32>
    %217 = arith.cmpi sgt, %2, %216 : vector<8x1xi32>
    %cst_47 = arith.constant 0.000000e+00 : f32
    %218 = vector.broadcast %cst_47 : f32 to vector<8x128xf32>
    %219 = vector.shape_cast %217 : vector<8x1xi1> to vector<8x1xi1>
    %220 = vector.broadcast %219 : vector<8x1xi1> to vector<8x128xi1>
    %221 = arith.select %220, %215, %218 : vector<8x128xi1>, vector<8x128xf32>
    %222 = arith.index_cast %c4_i32 : i32 to index
    %c0_48 = arith.constant 0 : index
    %c0_49 = arith.constant 0 : index
    %223 = vector.load %arg9[%222, %c0_48, %c0_49] : memref<8x8x128xf32, #tpu.memory_space<vmem>>, vector<1x8x128xf32>
    %224 = vector.shape_cast %223 : vector<1x8x128xf32> to vector<8x128xf32>
    %225 = vector.shape_cast %221 : vector<8x128xf32> to vector<1x8x128xf32>
    tpu.vector_store %arg9[%222, %c0_48, %c0_49], %225 {strides = array<i32>} : memref<8x8x128xf32, #tpu.memory_space<vmem>>, vector<1x8x128xf32>,
    %226 = vector.shape_cast %217 : vector<8x1xi1> to vector<8x1xi1>
    %227 = vector.broadcast %226 : vector<8x1xi1> to vector<8x128xi1>
    %228 = arith.select %227, %215, %183 : vector<8x128xi1>, vector<8x128xf32>
    %c5_i32 = arith.constant 5 : i32
    %229 = arith.index_cast %c5_i32 : i32 to index
    %c0_50 = arith.constant 0 : index
    %c0_51 = arith.constant 0 : index
    %230 = vector.load %arg2[%229, %c0_50, %c0_51] : memref<8x8x384xf32, #tpu.memory_space<vmem>>, vector<1x8x384xf32>
    %231 = vector.shape_cast %230 : vector<1x8x384xf32> to vector<8x384xf32>
    %cst_52 = arith.constant dense<0.000000e+00> : vector<8x384xf32>
    %232 = tpu.matmul %228, %0, %cst_52 {dimension_numbers = #tpu.dot_dimension_numbers<[1], [0], [0], [1], [0, 0, 1, 1], [], []>} : vector<8x128xf32>, vector<128x384xf32>, vector<8x384xf32> -> vector<8x384xf32>
    %233 = vector.broadcast %1 : vector<1x384xf32> to vector<8x384xf32>
    %234 = arith.addf %232, %233 : vector<8x384xf32>
    %235 = vector.extract_strided_slice %231 {offsets = [0, 0], sizes = [8, 128], strides = [1, 1]} : vector<8x384xf32> to vector<8x128xf32>
    %236 = vector.extract_strided_slice %234 {offsets = [0, 0], sizes = [8, 128], strides = [1, 1]} : vector<8x384xf32> to vector<8x128xf32>
    %237 = arith.addf %235, %236 : vector<8x128xf32>
    %238 = arith.negf %237 : vector<8x128xf32>
    %239 = math.exp %238 : vector<8x128xf32>
    %cst_53 = arith.constant 1.000000e+00 : f32
    %240 = vector.broadcast %cst_53 : f32 to vector<8x128xf32>
    %241 = arith.addf %240, %239 : vector<8x128xf32>
    %242 = arith.divf %240, %241 : vector<8x128xf32>
    %243 = vector.extract_strided_slice %231 {offsets = [0, 128], sizes = [8, 128], strides = [1, 1]} : vector<8x384xf32> to vector<8x128xf32>
    %244 = vector.extract_strided_slice %234 {offsets = [0, 128], sizes = [8, 128], strides = [1, 1]} : vector<8x384xf32> to vector<8x128xf32>
    %245 = arith.addf %243, %244 : vector<8x128xf32>
    %246 = arith.negf %245 : vector<8x128xf32>
    %247 = math.exp %246 : vector<8x128xf32>
    %cst_54 = arith.constant 1.000000e+00 : f32
    %248 = vector.broadcast %cst_54 : f32 to vector<8x128xf32>
    %249 = arith.addf %248, %247 : vector<8x128xf32>
    %250 = arith.divf %248, %249 : vector<8x128xf32>
    %251 = vector.extract_strided_slice %231 {offsets = [0, 256], sizes = [8, 128], strides = [1, 1]} : vector<8x384xf32> to vector<8x128xf32>
    %252 = vector.extract_strided_slice %234 {offsets = [0, 256], sizes = [8, 128], strides = [1, 1]} : vector<8x384xf32> to vector<8x128xf32>
    %253 = arith.mulf %242, %252 : vector<8x128xf32>
    %254 = arith.addf %251, %253 : vector<8x128xf32>
    %255 = math.tanh %254 : vector<8x128xf32>
    %cst_55 = arith.constant 1.000000e+00 : f32
    %256 = vector.broadcast %cst_55 : f32 to vector<8x128xf32>
    %257 = arith.subf %256, %250 : vector<8x128xf32>
    %258 = arith.mulf %257, %255 : vector<8x128xf32>
    %259 = arith.mulf %250, %228 : vector<8x128xf32>
    %260 = arith.addf %258, %259 : vector<8x128xf32>
    %261 = vector.broadcast %c5_i32 : i32 to vector<8x1xi32>
    %262 = arith.cmpi sgt, %2, %261 : vector<8x1xi32>
    %cst_56 = arith.constant 0.000000e+00 : f32
    %263 = vector.broadcast %cst_56 : f32 to vector<8x128xf32>
    %264 = vector.shape_cast %262 : vector<8x1xi1> to vector<8x1xi1>
    %265 = vector.broadcast %264 : vector<8x1xi1> to vector<8x128xi1>
    %266 = arith.select %265, %260, %263 : vector<8x128xi1>, vector<8x128xf32>
    %267 = arith.index_cast %c5_i32 : i32 to index
    %c0_57 = arith.constant 0 : index
    %c0_58 = arith.constant 0 : index
    %268 = vector.load %arg9[%267, %c0_57, %c0_58] : memref<8x8x128xf32, #tpu.memory_space<vmem>>, vector<1x8x128xf32>
    %269 = vector.shape_cast %268 : vector<1x8x128xf32> to vector<8x128xf32>
    %270 = vector.shape_cast %266 : vector<8x128xf32> to vector<1x8x128xf32>
    tpu.vector_store %arg9[%267, %c0_57, %c0_58], %270 {strides = array<i32>} : memref<8x8x128xf32, #tpu.memory_space<vmem>>, vector<1x8x128xf32>,
    %271 = vector.shape_cast %262 : vector<8x1xi1> to vector<8x1xi1>
    %272 = vector.broadcast %271 : vector<8x1xi1> to vector<8x128xi1>
    %273 = arith.select %272, %260, %228 : vector<8x128xi1>, vector<8x128xf32>
    %c6_i32 = arith.constant 6 : i32
    %274 = arith.index_cast %c6_i32 : i32 to index
    %c0_59 = arith.constant 0 : index
    %c0_60 = arith.constant 0 : index
    %275 = vector.load %arg2[%274, %c0_59, %c0_60] : memref<8x8x384xf32, #tpu.memory_space<vmem>>, vector<1x8x384xf32>
    %276 = vector.shape_cast %275 : vector<1x8x384xf32> to vector<8x384xf32>
    %cst_61 = arith.constant dense<0.000000e+00> : vector<8x384xf32>
    %277 = tpu.matmul %273, %0, %cst_61 {dimension_numbers = #tpu.dot_dimension_numbers<[1], [0], [0], [1], [0, 0, 1, 1], [], []>} : vector<8x128xf32>, vector<128x384xf32>, vector<8x384xf32> -> vector<8x384xf32>
    %278 = vector.broadcast %1 : vector<1x384xf32> to vector<8x384xf32>
    %279 = arith.addf %277, %278 : vector<8x384xf32>
    %280 = vector.extract_strided_slice %276 {offsets = [0, 0], sizes = [8, 128], strides = [1, 1]} : vector<8x384xf32> to vector<8x128xf32>
    %281 = vector.extract_strided_slice %279 {offsets = [0, 0], sizes = [8, 128], strides = [1, 1]} : vector<8x384xf32> to vector<8x128xf32>
    %282 = arith.addf %280, %281 : vector<8x128xf32>
    %283 = arith.negf %282 : vector<8x128xf32>
    %284 = math.exp %283 : vector<8x128xf32>
    %cst_62 = arith.constant 1.000000e+00 : f32
    %285 = vector.broadcast %cst_62 : f32 to vector<8x128xf32>
    %286 = arith.addf %285, %284 : vector<8x128xf32>
    %287 = arith.divf %285, %286 : vector<8x128xf32>
    %288 = vector.extract_strided_slice %276 {offsets = [0, 128], sizes = [8, 128], strides = [1, 1]} : vector<8x384xf32> to vector<8x128xf32>
    %289 = vector.extract_strided_slice %279 {offsets = [0, 128], sizes = [8, 128], strides = [1, 1]} : vector<8x384xf32> to vector<8x128xf32>
    %290 = arith.addf %288, %289 : vector<8x128xf32>
    %291 = arith.negf %290 : vector<8x128xf32>
    %292 = math.exp %291 : vector<8x128xf32>
    %cst_63 = arith.constant 1.000000e+00 : f32
    %293 = vector.broadcast %cst_63 : f32 to vector<8x128xf32>
    %294 = arith.addf %293, %292 : vector<8x128xf32>
    %295 = arith.divf %293, %294 : vector<8x128xf32>
    %296 = vector.extract_strided_slice %276 {offsets = [0, 256], sizes = [8, 128], strides = [1, 1]} : vector<8x384xf32> to vector<8x128xf32>
    %297 = vector.extract_strided_slice %279 {offsets = [0, 256], sizes = [8, 128], strides = [1, 1]} : vector<8x384xf32> to vector<8x128xf32>
    %298 = arith.mulf %287, %297 : vector<8x128xf32>
    %299 = arith.addf %296, %298 : vector<8x128xf32>
    %300 = math.tanh %299 : vector<8x128xf32>
    %cst_64 = arith.constant 1.000000e+00 : f32
    %301 = vector.broadcast %cst_64 : f32 to vector<8x128xf32>
    %302 = arith.subf %301, %295 : vector<8x128xf32>
    %303 = arith.mulf %302, %300 : vector<8x128xf32>
    %304 = arith.mulf %295, %273 : vector<8x128xf32>
    %305 = arith.addf %303, %304 : vector<8x128xf32>
    %306 = vector.broadcast %c6_i32 : i32 to vector<8x1xi32>
    %307 = arith.cmpi sgt, %2, %306 : vector<8x1xi32>
    %cst_65 = arith.constant 0.000000e+00 : f32
    %308 = vector.broadcast %cst_65 : f32 to vector<8x128xf32>
    %309 = vector.shape_cast %307 : vector<8x1xi1> to vector<8x1xi1>
    %310 = vector.broadcast %309 : vector<8x1xi1> to vector<8x128xi1>
    %311 = arith.select %310, %305, %308 : vector<8x128xi1>, vector<8x128xf32>
    %312 = arith.index_cast %c6_i32 : i32 to index
    %c0_66 = arith.constant 0 : index
    %c0_67 = arith.constant 0 : index
    %313 = vector.load %arg9[%312, %c0_66, %c0_67] : memref<8x8x128xf32, #tpu.memory_space<vmem>>, vector<1x8x128xf32>
    %314 = vector.shape_cast %313 : vector<1x8x128xf32> to vector<8x128xf32>
    %315 = vector.shape_cast %311 : vector<8x128xf32> to vector<1x8x128xf32>
    tpu.vector_store %arg9[%312, %c0_66, %c0_67], %315 {strides = array<i32>} : memref<8x8x128xf32, #tpu.memory_space<vmem>>, vector<1x8x128xf32>,
    %316 = vector.shape_cast %307 : vector<8x1xi1> to vector<8x1xi1>
    %317 = vector.broadcast %316 : vector<8x1xi1> to vector<8x128xi1>
    %318 = arith.select %317, %305, %273 : vector<8x128xi1>, vector<8x128xf32>
    %c7_i32 = arith.constant 7 : i32
    %319 = arith.index_cast %c7_i32 : i32 to index
    %c0_68 = arith.constant 0 : index
    %c0_69 = arith.constant 0 : index
    %320 = vector.load %arg2[%319, %c0_68, %c0_69] : memref<8x8x384xf32, #tpu.memory_space<vmem>>, vector<1x8x384xf32>
    %321 = vector.shape_cast %320 : vector<1x8x384xf32> to vector<8x384xf32>
    %cst_70 = arith.constant dense<0.000000e+00> : vector<8x384xf32>
    %322 = tpu.matmul %318, %0, %cst_70 {dimension_numbers = #tpu.dot_dimension_numbers<[1], [0], [0], [1], [0, 0, 1, 1], [], []>} : vector<8x128xf32>, vector<128x384xf32>, vector<8x384xf32> -> vector<8x384xf32>
    %323 = vector.broadcast %1 : vector<1x384xf32> to vector<8x384xf32>
    %324 = arith.addf %322, %323 : vector<8x384xf32>
    %325 = vector.extract_strided_slice %321 {offsets = [0, 0], sizes = [8, 128], strides = [1, 1]} : vector<8x384xf32> to vector<8x128xf32>
    %326 = vector.extract_strided_slice %324 {offsets = [0, 0], sizes = [8, 128], strides = [1, 1]} : vector<8x384xf32> to vector<8x128xf32>
    %327 = arith.addf %325, %326 : vector<8x128xf32>
    %328 = arith.negf %327 : vector<8x128xf32>
    %329 = math.exp %328 : vector<8x128xf32>
    %cst_71 = arith.constant 1.000000e+00 : f32
    %330 = vector.broadcast %cst_71 : f32 to vector<8x128xf32>
    %331 = arith.addf %330, %329 : vector<8x128xf32>
    %332 = arith.divf %330, %331 : vector<8x128xf32>
    %333 = vector.extract_strided_slice %321 {offsets = [0, 128], sizes = [8, 128], strides = [1, 1]} : vector<8x384xf32> to vector<8x128xf32>
    %334 = vector.extract_strided_slice %324 {offsets = [0, 128], sizes = [8, 128], strides = [1, 1]} : vector<8x384xf32> to vector<8x128xf32>
    %335 = arith.addf %333, %334 : vector<8x128xf32>
    %336 = arith.negf %335 : vector<8x128xf32>
    %337 = math.exp %336 : vector<8x128xf32>
    %cst_72 = arith.constant 1.000000e+00 : f32
    %338 = vector.broadcast %cst_72 : f32 to vector<8x128xf32>
    %339 = arith.addf %338, %337 : vector<8x128xf32>
    %340 = arith.divf %338, %339 : vector<8x128xf32>
    %341 = vector.extract_strided_slice %321 {offsets = [0, 256], sizes = [8, 128], strides = [1, 1]} : vector<8x384xf32> to vector<8x128xf32>
    %342 = vector.extract_strided_slice %324 {offsets = [0, 256], sizes = [8, 128], strides = [1, 1]} : vector<8x384xf32> to vector<8x128xf32>
    %343 = arith.mulf %332, %342 : vector<8x128xf32>
    %344 = arith.addf %341, %343 : vector<8x128xf32>
    %345 = math.tanh %344 : vector<8x128xf32>
    %cst_73 = arith.constant 1.000000e+00 : f32
    %346 = vector.broadcast %cst_73 : f32 to vector<8x128xf32>
    %347 = arith.subf %346, %340 : vector<8x128xf32>
    %348 = arith.mulf %347, %345 : vector<8x128xf32>
    %349 = arith.mulf %340, %318 : vector<8x128xf32>
    %350 = arith.addf %348, %349 : vector<8x128xf32>
    %351 = vector.broadcast %c7_i32 : i32 to vector<8x1xi32>
    %352 = arith.cmpi sgt, %2, %351 : vector<8x1xi32>
    %cst_74 = arith.constant 0.000000e+00 : f32
    %353 = vector.broadcast %cst_74 : f32 to vector<8x128xf32>
    %354 = vector.shape_cast %352 : vector<8x1xi1> to vector<8x1xi1>
    %355 = vector.broadcast %354 : vector<8x1xi1> to vector<8x128xi1>
    %356 = arith.select %355, %350, %353 : vector<8x128xi1>, vector<8x128xf32>
    %357 = arith.index_cast %c7_i32 : i32 to index
    %c0_75 = arith.constant 0 : index
    %c0_76 = arith.constant 0 : index
    %358 = vector.load %arg9[%357, %c0_75, %c0_76] : memref<8x8x128xf32, #tpu.memory_space<vmem>>, vector<1x8x128xf32>
    %359 = vector.shape_cast %358 : vector<1x8x128xf32> to vector<8x128xf32>
    %360 = vector.shape_cast %356 : vector<8x128xf32> to vector<1x8x128xf32>
    tpu.vector_store %arg9[%357, %c0_75, %c0_76], %360 {strides = array<i32>} : memref<8x8x128xf32, #tpu.memory_space<vmem>>, vector<1x8x128xf32>,
    %361 = vector.shape_cast %352 : vector<8x1xi1> to vector<8x1xi1>
    %362 = vector.broadcast %361 : vector<8x1xi1> to vector<8x128xi1>
    %363 = arith.select %362, %350, %318 : vector<8x128xi1>, vector<8x128xf32>
    %c8_i32 = arith.constant 8 : i32
    %c0_77 = arith.constant 0 : index
    %c0_78 = arith.constant 0 : index
    %364 = vector.load %arg10[%c0_77, %c0_78] : memref<8x128xf32, #tpu.memory_space<vmem>>, vector<8x128xf32>
    tpu.vector_store %arg10[%c0_77, %c0_78], %363 {strides = array<i32>} : memref<8x128xf32, #tpu.memory_space<vmem>>, vector<8x128xf32>,
    %c0_79 = arith.constant 0 : index
    %c0_80 = arith.constant 0 : index
    %c0_81 = arith.constant 0 : index
    %365 = vector.load %arg5[%c0_79, %c0_80, %c0_81] : memref<8x16x128xf32, #tpu.memory_space<vmem>>, vector<8x16x128xf32>
    %366 = vector.shape_cast %363 : vector<8x128xf32> to vector<8x1x128xf32>
    "tpu.trace_start"() <{level = 10 : i32, message = "bqh,bkh->bqk"}> : () -> ()
    %cst_82 = arith.constant dense<0.000000e+00> : vector<8x1x16xf32>
    %367 = tpu.matmul %366, %365, %cst_82 {dimension_numbers = #tpu.dot_dimension_numbers<[2], [2], [1], [1], [0, 0, 0, 1, 1, 1], [0], [0]>} : vector<8x1x128xf32>, vector<8x16x128xf32>, vector<8x1x16xf32> -> vector<8x1x16xf32>
    "tpu.trace_stop"() : () -> ()
    %368 = vector.shape_cast %367 : vector<8x1x16xf32> to vector<8x16xf32>
    %369 = tpu.iota {dimensions = array<i32: 1>} : vector<8x16xi32>
    %c0_83 = arith.constant 0 : index
    %c0_84 = arith.constant 0 : index
    %370 = vector.load %arg1[%c0_83, %c0_84] : memref<8x1xi32, #tpu.memory_space<vmem>>, vector<8x1xi32>
    %371 = vector.broadcast %370 : vector<8x1xi32> to vector<8x16xi32>
    %372 = arith.cmpi slt, %369, %371 : vector<8x16xi32>
    %cst_85 = arith.constant -1.000000e+30 : f32
    %373 = vector.broadcast %cst_85 : f32 to vector<8x16xf32>
    %374 = arith.select %372, %368, %373 : vector<8x16xi1>, vector<8x16xf32>
    %cst_86 = arith.constant dense<0xFF800000> : vector<8xf32>
    %375 = vector.multi_reduction <maximumf>, %374, %cst_86 [1] : vector<8x16xf32> to vector<8xf32>
    %376 = vector.shape_cast %375 : vector<8xf32> to vector<8x1xf32>
    %377 = vector.broadcast %376 : vector<8x1xf32> to vector<8x16xf32>
    %378 = arith.subf %374, %377 : vector<8x16xf32>
    %379 = math.exp %378 : vector<8x16xf32>
    %cst_87 = arith.constant dense<0.000000e+00> : vector<8xf32>
    %380 = vector.multi_reduction <add>, %379, %cst_87 [1] : vector<8x16xf32> to vector<8xf32>
    %381 = vector.shape_cast %380 : vector<8xf32> to vector<8x1xf32>
    %382 = tpu.reciprocal %381 {approx = true} : vector<8x1xf32> -> vector<8x1xf32>
    %383 = vector.broadcast %382 : vector<8x1xf32> to vector<8x16xf32>
    %384 = arith.mulf %379, %383 : vector<8x16xf32>
    %c0_88 = arith.constant 0 : index
    %c0_89 = arith.constant 0 : index
    %385 = vector.load %arg12[%c0_88, %c0_89] : memref<8x16xf32, #tpu.memory_space<vmem>>, vector<8x16xf32>
    tpu.vector_store %arg12[%c0_88, %c0_89], %384 {strides = array<i32>} : memref<8x16xf32, #tpu.memory_space<vmem>>, vector<8x16xf32>,
    %386 = vector.shape_cast %384 : vector<8x16xf32> to vector<8x1x16xf32>
    "tpu.trace_start"() <{level = 10 : i32, message = "bqk,bkh->bqh"}> : () -> ()
    %cst_90 = arith.constant dense<0.000000e+00> : vector<8x1x128xf32>
    %387 = tpu.matmul %386, %365, %cst_90 {dimension_numbers = #tpu.dot_dimension_numbers<[2], [1], [1], [2], [0, 0, 0, 1, 1, 2], [0], [0]>} : vector<8x1x16xf32>, vector<8x16x128xf32>, vector<8x1x128xf32> -> vector<8x1x128xf32>
    "tpu.trace_stop"() : () -> ()
    %388 = vector.shape_cast %387 : vector<8x1x128xf32> to vector<8x128xf32>
    %c0_91 = arith.constant 0 : index
    %c0_92 = arith.constant 0 : index
    %389 = vector.load %arg6[%c0_91, %c0_92] : memref<128x128xf32, #tpu.memory_space<vmem>>, vector<128x128xf32>
    %cst_93 = arith.constant dense<0.000000e+00> : vector<8x128xf32>
    %390 = tpu.matmul %388, %389, %cst_93 {dimension_numbers = #tpu.dot_dimension_numbers<[1], [0], [0], [1], [0, 0, 1, 1], [], []>} : vector<8x128xf32>, vector<128x128xf32>, vector<8x128xf32> -> vector<8x128xf32>
    %c0_94 = arith.constant 0 : index
    %c0_95 = arith.constant 0 : index
    %391 = vector.load %arg7[%c0_94, %c0_95] : memref<128x128xf32, #tpu.memory_space<vmem>>, vector<128x128xf32>
    %cst_96 = arith.constant dense<0.000000e+00> : vector<8x128xf32>
    %392 = tpu.matmul %363, %391, %cst_96 {dimension_numbers = #tpu.dot_dimension_numbers<[1], [0], [0], [1], [0, 0, 1, 1], [], []>} : vector<8x128xf32>, vector<128x128xf32>, vector<8x128xf32> -> vector<8x128xf32>
    %393 = arith.addf %390, %392 : vector<8x128xf32>
    %c0_97 = arith.constant 0 : index
    %c0_98 = arith.constant 0 : index
    %394 = vector.load %arg8[%c0_97, %c0_98] : memref<1x128xf32, #tpu.memory_space<vmem>>, vector<1x128xf32>
    %395 = vector.broadcast %394 : vector<1x128xf32> to vector<8x128xf32>
    %396 = arith.addf %393, %395 : vector<8x128xf32>
    %397 = math.tanh %396 : vector<8x128xf32>
    %c0_99 = arith.constant 0 : index
    %c0_100 = arith.constant 0 : index
    %398 = vector.load %arg11[%c0_99, %c0_100] : memref<8x128xf32, #tpu.memory_space<vmem>>, vector<8x128xf32>
    tpu.vector_store %arg11[%c0_99, %c0_100], %397 {strides = array<i32>} : memref<8x128xf32, #tpu.memory_space<vmem>>, vector<8x128xf32>,
    return
  }
}

</mosaic_0001>

<bundles_post_ra>
// kernel: question_model_forward.1
= control target key start
LH: loop header
LB: loop body
LE: loop exit
PB: predicated region body
PF: predicated region fallthrough
CT: control target
= control target key end

     0   :  { %18 = vsyncpa [#allocation3], 0  ;;  %s1845_s24 = smov [#allocation2]   ;;  %s1846_s26 = smov 128   ;;  %s3123_s0 = inlined_call_operand.vmem [shape: s32[8,1], index: 0, kind: input, shape index: {}]   ;;  %s3124_s1 = inlined_call_operand.vmem [shape: s32[8,1], index: 1, kind: input, shape index: {}]   ;;  %s3125_s2 = inlined_call_operand.vmem [shape: f32[8,8,384], index: 2, kind: input, shape index: {}]   ;;  %s3126_s3 = inlined_call_operand.vmem [shape: f32[128,384], index: 3, kind: input, shape index: {}]   ;;  %s3127_s4 = inlined_call_operand.vmem [shape: f32[1,384], index: 4, kind: input, shape index: {}]   ;;  %s3128_s5 = inlined_call_operand.vmem [shape: f32[8,16,128], index: 5, kind: input, shape index: {}]   ;;  %s3129_s6 = inlined_call_operand.vmem [shape: f32[128,128], index: 6, kind: input, shape index: {}]   ;;  %s3130_s7 = inlined_call_operand.hbm [shape: f32[128,128], index: 7, kind: input, shape index: {}]   ;;  %s3131_s8 = inlined_call_operand.vmem [shape: f32[1,128], index: 8, kind: input, shape index: {}]   ;;  %s3132_s9 = inlined_call_operand.vmem [shape: f32[8,8,128], index: 9, kind: output, shape index: {0}]   ;;  %s3133_s10 = inlined_call_operand.vmem [shape: f32[8,128], index: 10, kind: output, shape index: {1}]   ;;  %s3134_s11 = inlined_call_operand.vmem [shape: f32[8,128], index: 11, kind: output, shape index: {2}]   ;;  %s3135_s12 = inlined_call_operand.vmem [shape: f32[8,16], index: 12, kind: output, shape index: {3}]  }
   0x1   :  { %s37_s23 = sshll.u32 %s3130_s7, 4  ;;  %s39_s25 = sshll.u32 %s1845_s24, 4  ;;  %s38_s23 = int_to_ptr.hbm [resolvable:$true] %s37_s23  ;;  %s40_s25 = int_to_ptr.vmem [resolvable:$true] %s39_s25 }
   0x2   :  { %s1847_s27 = smov 8  }
   0x3   :  { %45 = dma.hbm_to_vmem [thread:$0]  %s38_s23, 2048, %s40_s25, [#allocation3], %s1846_s26, %s1846_s26, %s1847_s27  }
   0x4   :  { %1843 = dma.done.wait [#allocation3], 2048  }
   0x5   :  { %1844 = vsyncadd [#allocation3], 4294965248  ;;  %v1921_v0 = vld [vmem:[%s3126_s3 + $0x168] sm:$0xff]  ;;  %v1926_v1 = vld [vmem:[%s3126_s3 + $0x170] sm:$0xff]  ;;  %v3136_v19 = vmov 0   ;;  %v1849_v48 = vmov 0.0  }
   0x6   :  { %v1931_v2 = vld [vmem:[%s3126_s3 + $0x150] sm:$0xff]  ;;  %112 = vmatpush.msra.mxu0 %v1921_v0  ;;  %132 = vmatpush.msra.mxu1 %v1926_v1  ;;  %v1938_v3 = vld [vmem:[%s3126_s3 + $0x158] sm:$0xff]  ;;  %v1948_v5 = vld [vmem:[%s3126_s3 + $0x140] sm:$0xff] }
   0x7   :  { %v1943_v4 = vld [vmem:[%s3126_s3 + $0x138] sm:$0xff]  ;;  %231 = vmatpush.msra.mxu3 %v1921_v0  ;;  %v1956_v6 = vld [vmem:[%s3126_s3 + $0x120] sm:$0xff]  ;;  %v1961_v7 = vld [vmem:[%s3126_s3 + $0x128] sm:$0xff]  ;;  %1680 = vset.pattern.permute.xlu0 %v3136_v19 }
   0x8   :  { %113 = vmatpush.msra.mxu0 %v1931_v2  ;;  %133 = vmatpush.msra.mxu1 %v1938_v3  ;;  %v1969_v8 = vld [vmem:[%s3126_s3 + $0x108] sm:$0xff]  ;;  %v1974_v9 = vld [vmem:[%s3126_s3 + $0x110] sm:$0xff]  ;;  %v1987_v11 = vld [vmem:[%s3126_s3 + $0xf8] sm:$0xff] }
   0x9   :  { %232 = vmatpush.msra.mxu3 %v1931_v2  ;;  %v1982_v10 = vld [vmem:[%s3126_s3 + $0xf0] sm:$0xff]  ;;  %v1992_v12 = vld [vmem:[%s3126_s3 + $0x178] sm:$0xff]  ;;  %v2000_v13 = vld [vmem:[%s3126_s3 + $0x160] sm:$0xff]  ;;  %1681 = vset.pattern.permute.xlu1 %v3136_v19 }
   0xa   :  { %114 = vmatpush.msra.mxu0 %v1943_v4  ;;  %134 = vmatpush.msra.mxu1 %v1948_v5  ;;  %v2005_v14 = vld [vmem:[%s3126_s3 + $0xd8] sm:$0xff]  ;;  %v2010_v15 = vld [vmem:[%s3126_s3 + $0xe0] sm:$0xff]  ;;  %v2019_v16 = vld [vmem:[%s3126_s3 + $0x148] sm:$0xff] }
   0xb   :  { %233 = vmatpush.msra.mxu3 %v1943_v4  ;;  %152 = vmatpush.msra.mxu2 %v1992_v12  ;;  %v2024_v17 = vld [vmem:[%s3126_s3 + $0xc0] sm:$0xff]  ;;  %v2029_v18 = vld [vmem:[%s3126_s3 + $0xc8] sm:$0xff]  ;;  %v2038_v20 = vld [vmem:[%s3126_s3 + $0x130] sm:$0xff] }
   0xc   :  { %115 = vmatpush.msra.mxu0 %v1956_v6  ;;  %135 = vmatpush.msra.mxu1 %v1961_v7  ;;  %v2043_v21 = vld [vmem:[%s3126_s3 + $0xa8] sm:$0xff]  ;;  %v2048_v22 = vld [vmem:[%s3126_s3 + $0xb0] sm:$0xff]  ;;  %v2057_v23 = vld [vmem:[%s3126_s3 + $0x118] sm:$0xff] }
   0xd   :  { %234 = vmatpush.msra.mxu3 %v1956_v6  ;;  %153 = vmatpush.msra.mxu2 %v2000_v13  ;;  %v2062_v24 = vld [vmem:[%s3126_s3 + $0x90] sm:$0xff]  ;;  %v2067_v25 = vld [vmem:[%s3126_s3 + $0x98] sm:$0xff]  ;;  %v2073_v26 = vld [vmem:[%s3123_s0] sm:$0xff] }
   0xe   :  { %116 = vmatpush.msra.mxu0 %v1969_v8  ;;  %136 = vmatpush.msra.mxu1 %v1974_v9  ;;  %3160 = vst [vmem:[#allocation5_spill] sm:$0xff] %v2073_v26  ;;  %v2081_v27 = vld [vmem:[%s3126_s3 + $0x100] sm:$0xff]  ;;  %vm219_vm0 = vcmp.gt.s32.totalorder %v2073_v26, 0  ;;  %v2087_v28 = vld [vmem:[%s3126_s3 + $0x78] sm:$0xff]  ;;  %v2102_v31 = vld [vmem:[%s3126_s3 + $0xe8] sm:$0xff]  ;;  %vm338_vm1 = vcmp.gt.s32.totalorder %v2073_v26, 1 }
   0xf   :  { %235 = vmatpush.msra.mxu3 %v1969_v8  ;;  %154 = vmatpush.msra.mxu2 %v2019_v16  ;;  %v2092_v29 = vld [vmem:[%s3126_s3 + $0x80] sm:$0xff]  ;;  %v220_v30 = vsel %vm219_vm0, 1, %v3136_v19  ;;  %v2112_v33 = vld [vmem:[%s3126_s3 + $0x68] sm:$0xff]  ;;  %v2120_v34 = vld [vmem:[%s3126_s3 + $0xd0] sm:$0xff]  ;;  %v339_v41 = vsel %vm338_vm1, 1, %v3136_v19  ;;  %vm943_vm2 = vcmp.gt.s32.totalorder %v2073_v26, 6 }
  0x10   :  { %117 = vmatpush.msra.mxu0 %v1982_v10  ;;  %137 = vmatpush.msra.mxu1 %v1987_v11  ;;  %v2107_v32 = vld [vmem:[%s3126_s3 + $0x60] sm:$0xff]  ;;  %v2125_v35 = vld [vmem:[%s3126_s3 + $0x48] sm:$0xff]  ;;  %v2130_v36 = vld [vmem:[%s3126_s3 + $0x50] sm:$0xff]  ;;  %v944_v50 = vsel %vm943_vm2, 1, %v3136_v19 }
  0x11   :  { %236 = vmatpush.msra.mxu3 %v1982_v10  ;;  %155 = vmatpush.msra.mxu2 %v2038_v20  ;;  %v2140_v37 = vld [vmem:[%s3126_s3 + $0xb8] sm:$0xff]  ;;  %v2145_v38 = vld [vmem:[%s3126_s3 + $0x30] sm:$0xff]  ;;  %v2159_v40 = vld [vmem:[%s3126_s3 + $0xa0] sm:$0xff] }
  0x12   :  { %118 = vmatpush.msra.mxu0 %v2005_v14  ;;  %138 = vmatpush.msra.mxu1 %v2010_v15  ;;  %v2150_v39 = vld [vmem:[%s3126_s3 + $0x38] sm:$0xff]  ;;  %v2170_v43 = vld [vmem:[%s3126_s3 + $0x20] sm:$0xff]  ;;  %v2179_v44 = vld [vmem:[%s3126_s3 + $0x88] sm:$0xff] }
  0x13   :  { %237 = vmatpush.msra.mxu3 %v2005_v14  ;;  %156 = vmatpush.msra.mxu2 %v2057_v23  ;;  %3161 = vst [vmem:[#allocation6_spill] sm:$0xff] %v2150_v39  ;;  %v2165_v42 = vld [vmem:[%s3126_s3 + $0x18] sm:$0xff]  ;;  %v2184_v45 = vld [vmem:[%s3126_s3] sm:$0xff]  ;;  %v2189_v46 = vld [vmem:[%s3126_s3 + $0x8] sm:$0xff] }
  0x14   :  { %119 = vmatpush.msra.mxu0 %v2024_v17  ;;  %139 = vmatpush.msra.mxu1 %v2029_v18  ;;  %3162 = vst [vmem:[#allocation7_spill] sm:$0xff] %v2165_v42  ;;  %v2198_v47 = vld [vmem:[%s3126_s3 + $0x70] sm:$0xff]  ;;  %v2207_v49 = vld [vmem:[%s3126_s3 + $0x58] sm:$0xff]  ;;  %v2215_v51 = vld [vmem:[%s3126_s3 + $0x40] sm:$0xff] }
  0x15   :  { %238 = vmatpush.msra.mxu3 %v2024_v17  ;;  %157 = vmatpush.msra.mxu2 %v2081_v27  ;;  %3163 = vst [vmem:[#allocation8_spill] sm:$0xff] %v2170_v43  ;;  %v2224_v52 = vld [vmem:[%s3126_s3 + $0x28] sm:$0xff]  ;;  %v2232_v53 = vld [vmem:[%s3126_s3 + $0x10] sm:$0xff]  ;;  %v100_v54 = vld [vmem:[%s3127_s4] sm:$0x7] }
  0x16   :  { %120 = vmatpush.msra.mxu0 %v2043_v21  ;;  %140 = vmatpush.msra.mxu1 %v2048_v22  ;;  %3164 = vst [vmem:[#allocation9_spill] sm:$0xff] %v2184_v45  ;;  %v2351_v55 = vperm.slane %v100_v54, 0  ;;  %v2353_v56 = vperm.slane %v100_v54, 1  ;;  %v102_v57 = vld [vmem:[%s3125_s2] sm:$0xff]  ;;  %v103_v59 = vld [vmem:[%s3125_s2 + $0x8] sm:$0xff] }
  0x17   :  { %222 = vperm.xlu0 %1680, %v220_v30   ;;  %158 = vmatpush.msra.mxu2 %v2102_v31  ;;  %3165 = vst [vmem:[#allocation10_spill] sm:$0xff] %v2189_v46 }
  0x18   :  { %121 = vmatpush.msra.mxu0 %v2062_v24  ;;  %141 = vmatpush.msra.mxu1 %v2067_v25  ;;  %3166 = vst [vmem:[#allocation11_spill] sm:$0xff] %v2224_v52 }
  0x19   :  { %239 = vmatpush.msra.mxu3 %v2043_v21  ;;  %159 = vmatpush.msra.mxu2 %v2120_v34  ;;  %3167 = vst [vmem:[#allocation12_spill] sm:$0xff] %v2232_v53 }
  0x1a   :  { %122 = vmatpush.msra.mxu0 %v2087_v28  ;;  %142 = vmatpush.msra.mxu1 %v2092_v29  ;;  %3168 = vst [vmem:[#allocation13_spill] sm:$0xff] %v2351_v55 }
  0x1b   :  { %240 = vmatpush.msra.mxu3 %v2062_v24  ;;  %160 = vmatpush.msra.mxu2 %v2140_v37  ;;  %3169 = vst [vmem:[#allocation14_spill] sm:$0xff] %v2353_v56 }
  0x1c   :  { %123 = vmatpush.msra.mxu0 %v2107_v32  ;;  %143 = vmatpush.msra.mxu1 %v2112_v33 }
  0x1d   :  { %241 = vmatpush.msra.mxu3 %v2087_v28  ;;  %161 = vmatpush.msra.mxu2 %v2159_v40 }
  0x1e   :  { %124 = vmatpush.msra.mxu0 %v2125_v35  ;;  %144 = vmatpush.msra.mxu1 %v2130_v36 }
  0x1f   :  { %341 = vperm.xlu0 %1680, %v339_v41   ;;  %162 = vmatpush.msra.mxu2 %v2179_v44 }
  0x20   :  { %125 = vmatpush.msra.mxu0 %v2145_v38  ;;  %145 = vmatpush.msra.mxu1 %v2150_v39 }
  0x21   :  { %242 = vmatpush.msra.mxu3 %v2107_v32  ;;  %163 = vmatpush.msra.mxu2 %v2198_v47 }
  0x22   :  { %126 = vmatpush.msra.mxu0 %v2165_v42  ;;  %146 = vmatpush.msra.mxu1 %v2170_v43 }
  0x23   :  { %243 = vmatpush.msra.mxu3 %v2125_v35  ;;  %164 = vmatpush.msra.mxu2 %v2207_v49 }
  0x24   :  { %127 = vmatpush.msra.mxu0 %v2184_v45  ;;  %147 = vmatpush.msra.mxu1 %v2189_v46 }
  0x25   :  { %128 = vmatmul.f32.vlgmr.msra.gmra.mxu0 %v1849_v48  ;;  %148 = vmatmul.f32.vlgmr.msra.gmra.mxu1 %v1849_v48 }
  0x26   :  { %251 = vmatpush.msrb.mxu0 %v1926_v1  ;;  %271 = vmatpush.msrb.mxu1 %v1992_v12 }
  0x27   :  { %946 = vperm.xlu0 %1680, %v944_v50   ;;  %165 = vmatpush.msra.mxu2 %v2215_v51 }
  0x28   :  { %252 = vmatpush.msrb.mxu0 %v1938_v3  ;;  %272 = vmatpush.msrb.mxu1 %v2000_v13 }
  0x29   :  { %244 = vmatpush.msra.mxu3 %v2145_v38  ;;  %166 = vmatpush.msra.mxu2 %v2224_v52 }
  0x2a   :  { %253 = vmatpush.msrb.mxu0 %v1948_v5  ;;  %273 = vmatpush.msrb.mxu1 %v2019_v16 }
  0x2b   :  { %245 = vmatpush.msra.mxu3 %v2165_v42  ;;  %167 = vmatpush.msra.mxu2 %v2232_v53 }
  0x2c   :  { %254 = vmatpush.msrb.mxu0 %v1961_v7  ;;  %274 = vmatpush.msrb.mxu1 %v2038_v20 }
  0x2d   :  { %168 = vmatmul.f32.vlgmr.msra.gmra.mxu2 %v1849_v48  ;;  %246 = vmatpush.msra.mxu3 %v2184_v45 }
  0x2e   :  { %255 = vmatpush.msrb.mxu0 %v1974_v9  ;;  %275 = vmatpush.msrb.mxu1 %v2057_v23 }
  0x2f   :  { %352 = vmatpush.msrb.mxu2 %v1921_v0  ;;  %372 = vmatpush.msrb.mxu3 %v1926_v1 }
  0x30   :  { %256 = vmatpush.msrb.mxu0 %v1987_v11  ;;  %276 = vmatpush.msrb.mxu1 %v2081_v27 }
  0x31   :  { %353 = vmatpush.msrb.mxu2 %v1931_v2  ;;  %373 = vmatpush.msrb.mxu3 %v1938_v3 }
  0x32   :  { %257 = vmatpush.msrb.mxu0 %v2010_v15  ;;  %277 = vmatpush.msrb.mxu1 %v2102_v31 }
  0x33   :  { %354 = vmatpush.msrb.mxu2 %v1943_v4  ;;  %374 = vmatpush.msrb.mxu3 %v1948_v5 }
  0x34   :  { %258 = vmatpush.msrb.mxu0 %v2029_v18  ;;  %278 = vmatpush.msrb.mxu1 %v2120_v34 }
  0x35   :  { %355 = vmatpush.msrb.mxu2 %v1956_v6  ;;  %375 = vmatpush.msrb.mxu3 %v1961_v7 }
  0x36   :  { %259 = vmatpush.msrb.mxu0 %v2048_v22  ;;  %279 = vmatpush.msrb.mxu1 %v2140_v37 }
  0x37   :  { %356 = vmatpush.msrb.mxu2 %v1969_v8  ;;  %376 = vmatpush.msrb.mxu3 %v1974_v9 }
  0x38   :  { %260 = vmatpush.msrb.mxu0 %v2067_v25  ;;  %280 = vmatpush.msrb.mxu1 %v2159_v40 }
  0x39   :  { %357 = vmatpush.msrb.mxu2 %v1982_v10  ;;  %377 = vmatpush.msrb.mxu3 %v1987_v11 }
  0x3a   :  { %261 = vmatpush.msrb.mxu0 %v2092_v29  ;;  %281 = vmatpush.msrb.mxu1 %v2179_v44 }
  0x3b   :  { %358 = vmatpush.msrb.mxu2 %v2005_v14  ;;  %378 = vmatpush.msrb.mxu3 %v2010_v15 }
  0x3c   :  { %262 = vmatpush.msrb.mxu0 %v2112_v33  ;;  %282 = vmatpush.msrb.mxu1 %v2198_v47 }
  0x3d   :  { %359 = vmatpush.msrb.mxu2 %v2024_v17  ;;  %379 = vmatpush.msrb.mxu3 %v2029_v18 }
  0x3e   :  { %263 = vmatpush.msrb.mxu0 %v2130_v36  ;;  %283 = vmatpush.msrb.mxu1 %v2207_v49 }
  0x3f   :  { %360 = vmatpush.msrb.mxu2 %v2043_v21  ;;  %380 = vmatpush.msrb.mxu3 %v2048_v22 }
  0x40   :  { %264 = vmatpush.msrb.mxu0 %v2150_v39  ;;  %284 = vmatpush.msrb.mxu1 %v2215_v51 }
  0x41   :  { %361 = vmatpush.msrb.mxu2 %v2062_v24  ;;  %381 = vmatpush.msrb.mxu3 %v2067_v25 }
  0x42   :  { %265 = vmatpush.msrb.mxu0 %v2170_v43  ;;  %285 = vmatpush.msrb.mxu1 %v2224_v52 }
  0x43   :  { %362 = vmatpush.msrb.mxu2 %v2087_v28  ;;  %382 = vmatpush.msrb.mxu3 %v2092_v29 }
  0x44   :  { %266 = vmatpush.msrb.mxu0 %v2189_v46  ;;  %286 = vmatpush.msrb.mxu1 %v2232_v53 }
  0x45   :  { %363 = vmatpush.msrb.mxu2 %v2107_v32  ;;  %383 = vmatpush.msrb.mxu3 %v2112_v33 }
  0x46   :  { %392 = vmatpush.msra.mxu0 %v1992_v12  ;;  %473 = vmatpush.msra.mxu1 %v1921_v0 }
  0x47   :  { %364 = vmatpush.msrb.mxu2 %v2125_v35  ;;  %384 = vmatpush.msrb.mxu3 %v2130_v36 }
  0x48   :  { %393 = vmatpush.msra.mxu0 %v2000_v13  ;;  %474 = vmatpush.msra.mxu1 %v1931_v2 }
  0x49   :  { %365 = vmatpush.msrb.mxu2 %v2145_v38  ;;  %385 = vmatpush.msrb.mxu3 %v2150_v39 }
  0x4a   :  { %394 = vmatpush.msra.mxu0 %v2019_v16  ;;  %475 = vmatpush.msra.mxu1 %v1943_v4 }
  0x4b   :  { %366 = vmatpush.msrb.mxu2 %v2165_v42  ;;  %386 = vmatpush.msrb.mxu3 %v2170_v43 }
  0x4c   :  { %395 = vmatpush.msra.mxu0 %v2038_v20  ;;  %476 = vmatpush.msra.mxu1 %v1956_v6 }
  0x4d   :  { %367 = vmatpush.msrb.mxu2 %v2184_v45  ;;  %387 = vmatpush.msrb.mxu3 %v2189_v46 }
  0x4e   :  { %396 = vmatpush.msra.mxu0 %v2057_v23  ;;  %477 = vmatpush.msra.mxu1 %v1969_v8 }
  0x4f   :  { %493 = vmatpush.msra.mxu2 %v1926_v1  ;;  %1682 = vset.pattern.permute.xlu2 %v3136_v19 }
  0x50   :  { %397 = vmatpush.msra.mxu0 %v2081_v27  ;;  %478 = vmatpush.msra.mxu1 %v1982_v10 }
  0x51   :  { %494 = vmatpush.msra.mxu2 %v1938_v3 }
  0x52   :  { %398 = vmatpush.msra.mxu0 %v2102_v31  ;;  %479 = vmatpush.msra.mxu1 %v2005_v14 }
  0x53   :  { %495 = vmatpush.msra.mxu2 %v1948_v5 }
  0x54   :  { %399 = vmatpush.msra.mxu0 %v2120_v34  ;;  %480 = vmatpush.msra.mxu1 %v2024_v17 }
  0x55   :  { %496 = vmatpush.msra.mxu2 %v1961_v7 }
  0x56   :  { %400 = vmatpush.msra.mxu0 %v2140_v37  ;;  %481 = vmatpush.msra.mxu1 %v2043_v21 }
  0x57   :  { %497 = vmatpush.msra.mxu2 %v1974_v9 }
  0x58   :  { %401 = vmatpush.msra.mxu0 %v2159_v40  ;;  %482 = vmatpush.msra.mxu1 %v2062_v24 }
  0x59   :  { %498 = vmatpush.msra.mxu2 %v1987_v11 }
  0x5a   :  { %402 = vmatpush.msra.mxu0 %v2179_v44  ;;  %483 = vmatpush.msra.mxu1 %v2087_v28 }
  0x5b   :  { %499 = vmatpush.msra.mxu2 %v2010_v15 }
  0x5c   :  { %403 = vmatpush.msra.mxu0 %v2198_v47  ;;  %484 = vmatpush.msra.mxu1 %v2107_v32 }
  0x5d   :  { %500 = vmatpush.msra.mxu2 %v2029_v18 }
  0x5e   :  { %404 = vmatpush.msra.mxu0 %v2207_v49  ;;  %485 = vmatpush.msra.mxu1 %v2125_v35 }
  0x5f   :  { %501 = vmatpush.msra.mxu2 %v2048_v22 }
  0x60   :  { %405 = vmatpush.msra.mxu0 %v2215_v51  ;;  %486 = vmatpush.msra.mxu1 %v2145_v38 }
  0x61   :  { %502 = vmatpush.msra.mxu2 %v2067_v25 }
  0x62   :  { %406 = vmatpush.msra.mxu0 %v2224_v52  ;;  %487 = vmatpush.msra.mxu1 %v2165_v42  ;;  %v2363_v52 = vperm.slane %v100_v54, 2  ;;  %v104_v54 = vld [vmem:[%s3125_s2 + $0x10] sm:$0xff] }
  0x63   :  { %503 = vmatpush.msra.mxu2 %v2092_v29 }
  0x64   :  { %407 = vmatpush.msra.mxu0 %v2232_v53  ;;  %488 = vmatpush.msra.mxu1 %v2184_v45  ;;  %3170 = vst [vmem:[#allocation15_spill] sm:$0xff] %v2363_v52 }
  0x65   :  { %504 = vmatpush.msra.mxu2 %v2112_v33 }
  0x67   :  { %505 = vmatpush.msra.mxu2 %v2130_v36 }
  0x69   :  { %506 = vmatpush.msra.mxu2 %v2150_v39 }
  0x6b   :  { %507 = vmatpush.msra.mxu2 %v2170_v43 }
  0x6d   :  { %508 = vmatpush.msra.mxu2 %v2189_v46 }
  0xa2   :  { %v129_v58 = vpop.f32.mrf.mxu0  ;;  %v149_v60 = vpop.f32.mrf.mxu1 }
  0xa3   :  { %v130_v61 = vadd.f32 %v129_v58, %v2351_v55  ;;  %v150_v62 = vadd.f32 %v149_v60, %v2353_v56 }
  0xa5   :  { %v172_v63 = vadd.f32 %v130_v61, %v102_v57  ;;  %v192_v30 = vadd.f32 %v150_v62, %v103_v59 }
  0xa7   :  { %v1620_v41 = vmul.f32 -1.442695, %v172_v63  ;;  %v1621_v48 = vmul.f32 -1.442695, %v192_v30 }
  0xa9   :  { %1684 = vpow2.f32 %v1620_v41 }
  0xaa   :  { %1686 = vpow2.f32 %v1621_v48 }
  0xaf   :  { %v1685_v50 = vpop.eup %1684 }
  0xb0   :  { %v1687_v19 = vpop.eup %1686  ;;  %v176_v26 = vadd.f32 1.0, %v1685_v50  ;;  %v169_v57 = vpop.f32.mrf.mxu2 }
  0xb1   :  { %v196_v46 = vadd.f32 1.0, %v1687_v19  ;;  %v170_v30 = vadd.f32 %v169_v57, %v2363_v52 }
  0xb2   :  { %1688 = vrcp.f32 %v176_v26  ;;  %v188_v59 = vand.u32 2147483648, %v176_v26  ;;  %v186_v62 = vand.u32 2147483647, %v176_v26  ;;  %vm182_vm4 = vweird.f32 %v176_v26 }
  0xb3   :  { %1690 = vrcp.f32 %v196_v46  ;;  %vm202_vm7 = vweird.f32 %v196_v46  ;;  %v206_v55 = vand.u32 2147483647, %v196_v46 }
  0xb4   :  { %v189_v19 = vor.u32 1.1754944e-38, %v188_v59  ;;  %vm187_vm6 = vcmp.eq.f32.partialorder %v186_v62, 8.507059e+37  ;;  %v223_v62 = vpop.permute.xlu0 %222 }
  0xb5   :  { %vm207_vm10 = vcmp.eq.f32.partialorder %v206_v55, 8.507059e+37  ;;  %vm224_vm11 = vcmp.eq.s32.totalorder %v223_v62, 1  ;;  %v3174_v55 = vld [vmem:[#allocation12_spill] sm:$0xff] }
  0xb8   :  { %v1689_v45 = vpop.eup %1688 }
  0xb9   :  { %v1691_v53 = vpop.eup %1690  ;;  %v178_v43 = vmul.f32 %v1689_v45, %v176_v26  ;;  %vm183_vm3 = vweird.f32 %v1689_v45 }
  0xba   :  { %v198_v42 = vmul.f32 %v1691_v53, %v196_v46  ;;  %vm184_vm5 = vmor %vm182_vm4, %vm183_vm3  ;;  %vm203_vm8 = vweird.f32 %v1691_v53 }
  0xbb   :  { %v179_v58 = vsub.f32 1.0, %v178_v43  ;;  %vm204_vm9 = vmor %vm202_vm7, %vm203_vm8 }
  0xbc   :  { %v199_v60 = vsub.f32 1.0, %v198_v42 }
  0xbd   :  { %v180_v61 = vmul.f32 %v1689_v45, %v179_v58  ;;  %v208_v58 = vand.u32 2147483648, %v196_v46  ;;  %v3171_v46 = vld [vmem:[#allocation11_spill] sm:$0xff] }
  0xbe   :  { %v200_v63 = vmul.f32 %v1691_v53, %v199_v60 }
  0xbf   :  { %v181_v41 = vadd.f32 %v1689_v45, %v180_v61  ;;  %v209_v26 = vor.u32 1.1754944e-38, %v208_v58 }
  0xc0   :  { %v201_v42 = vadd.f32 %v1691_v53, %v200_v63 }
  0xc1   :  { %v185_v48 = vsel %vm184_vm5, %v1689_v45, %v181_v41 }
  0xc2   :  { %v190_v43 = vsel %vm187_vm6, %v189_v19, %v185_v48  ;;  %v205_v57 = vsel %vm204_vm9, %v1691_v53, %v201_v42  ;;  %v3173_v53 = vld [vmem:[#allocation8_spill] sm:$0xff]  ;;  %v3176_v48 = vld [vmem:[#allocation10_spill] sm:$0xff] }
  0xc3   :  { %v212_v50 = vmul.f32 %v190_v43, %v170_v30  ;;  %v210_v59 = vsel %vm207_vm10, %v209_v26, %v205_v57  ;;  %v3175_v30 = vld [vmem:[#allocation9_spill] sm:$0xff] }
  0xc4   :  { %v215_v45 = vsub.f32 1.0, %v210_v59  ;;  %v217_v52 = vmul.f32 0.0, %v210_v59  ;;  %v3177_v26 = vld [vmem:[#allocation13_spill] sm:$0xff] }
  0xc5   :  { %v213_v60 = vadd.f32 %v212_v50, %v104_v54  ;;  %v1623_v54 = vld [vmem:[%s3125_s2 + $0x20] sm:$0xff] }
  0xc7   :  { %1692 = vtanh.f32 %v213_v60  ;;  %v1622_v60 = vld [vmem:[%s3125_s2 + $0x18] sm:$0xff] }
  0xcd   :  { %v1693_v61 = vpop.eup %1692 }
  0xce   :  { %v216_v41 = vmul.f32 %v1693_v61, %v215_v45 }
  0xd0   :  { %v218_v19 = vadd.f32 %v217_v52, %v216_v41  ;;  %v3172_v52 = vld [vmem:[#allocation7_spill] sm:$0xff] }
  0xd2   :  { %1625 = vmatmul.msk.f32.vlgmr.msra.gmra.mxu3 %vm224_vm11, %v218_v19  ;;  %1626 = vmatmul.msk.f32.vlgmr.msrb.gmra.mxu0 %vm224_vm11, %v218_v19  ;;  %v2369_v63 = vsel %vm224_vm11, %v218_v19, 0.0 }
  0xd3   :  { %1627 = vmatmul.msk.f32.vlgmr.msrb.gmra.mxu1 %vm224_vm11, %v218_v19  ;;  %226 = vst [vmem:[%s3132_s9] sm:$0xff] %v2369_v63  ;;  %513 = vmatpush.msra.mxu3 %v1992_v12 }
  0xd4   :  { %594 = vmatpush.msrb.mxu0 %v1921_v0  ;;  %614 = vmatpush.msrb.mxu1 %v1926_v1 }
  0xd5   :  { %514 = vmatpush.msra.mxu3 %v2000_v13 }
  0xd6   :  { %595 = vmatpush.msrb.mxu0 %v1931_v2  ;;  %615 = vmatpush.msrb.mxu1 %v1938_v3 }
  0xd7   :  { %515 = vmatpush.msra.mxu3 %v2019_v16 }
  0xd8   :  { %596 = vmatpush.msrb.mxu0 %v1943_v4  ;;  %616 = vmatpush.msrb.mxu1 %v1948_v5 }
  0xd9   :  { %516 = vmatpush.msra.mxu3 %v2038_v20 }
  0xda   :  { %597 = vmatpush.msrb.mxu0 %v1956_v6  ;;  %617 = vmatpush.msrb.mxu1 %v1961_v7 }
  0xdb   :  { %517 = vmatpush.msra.mxu3 %v2057_v23 }
  0xdc   :  { %598 = vmatpush.msrb.mxu0 %v1969_v8  ;;  %618 = vmatpush.msrb.mxu1 %v1974_v9 }
  0xdd   :  { %518 = vmatpush.msra.mxu3 %v2081_v27 }
  0xde   :  { %599 = vmatpush.msrb.mxu0 %v1982_v10  ;;  %619 = vmatpush.msrb.mxu1 %v1987_v11 }
  0xdf   :  { %519 = vmatpush.msra.mxu3 %v2102_v31 }
  0xe0   :  { %600 = vmatpush.msrb.mxu0 %v2005_v14  ;;  %620 = vmatpush.msrb.mxu1 %v2010_v15 }
  0xe1   :  { %520 = vmatpush.msra.mxu3 %v2120_v34 }
  0xe2   :  { %601 = vmatpush.msrb.mxu0 %v2024_v17  ;;  %621 = vmatpush.msrb.mxu1 %v2029_v18 }
  0xe3   :  { %521 = vmatpush.msra.mxu3 %v2140_v37 }
  0xe4   :  { %602 = vmatpush.msrb.mxu0 %v2043_v21  ;;  %622 = vmatpush.msrb.mxu1 %v2048_v22 }
  0xe5   :  { %522 = vmatpush.msra.mxu3 %v2159_v40 }
  0xe6   :  { %603 = vmatpush.msrb.mxu0 %v2062_v24  ;;  %623 = vmatpush.msrb.mxu1 %v2067_v25 }
  0xe7   :  { %523 = vmatpush.msra.mxu3 %v2179_v44 }
  0xe8   :  { %604 = vmatpush.msrb.mxu0 %v2087_v28  ;;  %624 = vmatpush.msrb.mxu1 %v2092_v29 }
  0xe9   :  { %524 = vmatpush.msra.mxu3 %v2198_v47 }
  0xea   :  { %605 = vmatpush.msrb.mxu0 %v2107_v32  ;;  %625 = vmatpush.msrb.mxu1 %v2112_v33 }
  0xeb   :  { %525 = vmatpush.msra.mxu3 %v2207_v49 }
  0xec   :  { %606 = vmatpush.msrb.mxu0 %v2125_v35  ;;  %626 = vmatpush.msrb.mxu1 %v2130_v36 }
  0xed   :  { %526 = vmatpush.msra.mxu3 %v2215_v51 }
  0xee   :  { %607 = vmatpush.msrb.mxu0 %v2145_v38  ;;  %627 = vmatpush.msrb.mxu1 %v2150_v39 }
  0xef   :  { %527 = vmatpush.msra.mxu3 %v3171_v46 }
  0xf0   :  { %608 = vmatpush.msrb.mxu0 %v3172_v52  ;;  %628 = vmatpush.msrb.mxu1 %v3173_v53 }
  0xf1   :  { %528 = vmatpush.msra.mxu3 %v3174_v55 }
  0xf2   :  { %609 = vmatpush.msrb.mxu0 %v3175_v30  ;;  %629 = vmatpush.msrb.mxu1 %v3176_v48 }
 0x14f   :  { %v268_v43 = vpop.f32.mrf.mxu0 }
 0x150   :  { %v269_v42 = vadd.f32 %v268_v43, %v2353_v56 }
 0x152   :  { %v311_v50 = vadd.f32 %v1623_v54, %v269_v42  ;;  %v3178_v54 = vld [vmem:[#allocation5_spill] sm:$0xff]  ;;  %v3179_v42 = vmov 0  }
 0x153   :  { %vm459_vm12 = vcmp.gt.s32.totalorder %v3178_v54, 2  ;;  %vm580_vm13 = vcmp.gt.s32.totalorder %v3178_v54, 3  ;;  %vm1064_vm1 = vcmp.gt.s32.totalorder %v3178_v54, 7 }
 0x154   :  { %v1629_v58 = vmul.f32 -1.442695, %v311_v50  ;;  %v460_v50 = vsel %vm459_vm12, 1, %v3179_v42 }
 0x155   :  { %v248_v57 = vpop.f32.mrf.mxu3  ;;  %462 = vperm.xlu1 %1681, %v460_v50   ;;  %v3180_v50 = vld [vmem:[#allocation15_spill] sm:$0xff] }
 0x156   :  { %1694 = vpow2.f32 %v1629_v58  ;;  %v249_v59 = vadd.f32 %v248_v57, %v3177_v26 }
 0x158   :  { %v291_v45 = vadd.f32 %v1622_v60, %v249_v59  ;;  %v581_v59 = vsel %vm580_vm13, 1, %v3179_v42 }
 0x15a   :  { %v1628_v61 = vmul.f32 -1.442695, %v291_v45 }
 0x15c   :  { %v1695_v62 = vpop.eup %1694  ;;  %1696 = vpow2.f32 %v1628_v61 }
 0x15d   :  { %v315_v41 = vadd.f32 1.0, %v1695_v62  ;;  %583 = vperm.xlu1 %1681, %v581_v59   ;;  %v1065_v59 = vsel %vm1064_vm1, 1, %v3179_v42 }
 0x15f   :  { %1698 = vrcp.f32 %v315_v41  ;;  %vm321_vm4 = vweird.f32 %v315_v41 }
 0x162   :  { %v1697_v19 = vpop.eup %1696 }
 0x163   :  { %v295_v48 = vadd.f32 1.0, %v1697_v19  ;;  %v288_v19 = vpop.f32.mrf.mxu1 }
 0x164   :  { %v289_v52 = vadd.f32 %v288_v19, %v3180_v50 }
 0x165   :  { %1700 = vrcp.f32 %v295_v48  ;;  %v1699_v43 = vpop.eup %1698  ;;  %v307_v45 = vand.u32 2147483648, %v295_v48  ;;  %v305_v62 = vand.u32 2147483647, %v295_v48  ;;  %vm301_vm15 = vweird.f32 %v295_v48  ;;  %1067 = vperm.xlu1 %1681, %v1065_v59  }
 0x166   :  { %v317_v56 = vmul.f32 %v1699_v43, %v315_v41  ;;  %vm322_vm3 = vweird.f32 %v1699_v43 }
 0x167   :  { %v308_v53 = vor.u32 1.1754944e-38, %v307_v45  ;;  %vm306_vm2 = vcmp.eq.f32.partialorder %v305_v62, 8.507059e+37  ;;  %vm323_vm5 = vmor %vm321_vm4, %vm322_vm3  ;;  %v342_v62 = vpop.permute.xlu0 %341 }
 0x168   :  { %v318_v60 = vsub.f32 1.0, %v317_v56  ;;  %vm343_vm7 = vcmp.eq.s32.totalorder %v342_v62, 1 }
 0x16a   :  { %v319_v26 = vmul.f32 %v1699_v43, %v318_v60  ;;  %v327_v60 = vand.u32 2147483648, %v315_v41 }
 0x16b   :  { %v1701_v30 = vpop.eup %1700 }
 0x16c   :  { %v297_v58 = vmul.f32 %v1701_v30, %v295_v48  ;;  %vm302_vm14 = vweird.f32 %v1701_v30  ;;  %v325_v48 = vand.u32 2147483647, %v315_v41 }
 0x16d   :  { %vm303_vm0 = vmor %vm301_vm15, %vm302_vm14 }
 0x16e   :  { %v298_v57 = vsub.f32 1.0, %v297_v58  ;;  %v1624_v58 = vld [vmem:[%s3125_s2 + $0x28] sm:$0xff]  ;;  %vm326_vm6 = vcmp.eq.f32.partialorder %v325_v48, 8.507059e+37 }
 0x170   :  { %v299_v61 = vmul.f32 %v1701_v30, %v298_v57  ;;  %v320_v57 = vadd.f32 %v1699_v43, %v319_v26 }
 0x172   :  { %v300_v55 = vadd.f32 %v1701_v30, %v299_v61  ;;  %v324_v54 = vsel %vm323_vm5, %v1699_v43, %v320_v57  ;;  %v328_v61 = vor.u32 1.1754944e-38, %v327_v60 }
 0x174   :  { %v304_v46 = vsel %vm303_vm0, %v1701_v30, %v300_v55 }
 0x175   :  { %v309_v56 = vsel %vm306_vm2, %v308_v53, %v304_v46  ;;  %v329_v46 = vsel %vm326_vm6, %v328_v61, %v324_v54  ;;  %v1633_v54 = vld [vmem:[%s3125_s2 + $0x40] sm:$0xff] }
 0x176   :  { %v331_v39 = vmul.f32 %v309_v56, %v289_v52  ;;  %v334_v53 = vsub.f32 1.0, %v329_v46  ;;  %v336_v26 = vmul.f32 %v329_v46, %v2369_v63 }
 0x178   :  { %v332_v45 = vadd.f32 %v1624_v58, %v331_v39 }
 0x17a   :  { %1702 = vtanh.f32 %v332_v45 }
 0x180   :  { %v1703_v55 = vpop.eup %1702 }
 0x181   :  { %v335_v30 = vmul.f32 %v1703_v55, %v334_v53 }
 0x183   :  { %v337_v52 = vadd.f32 %v336_v26, %v335_v30 }
 0x185   :  { %v344_v19 = vsel %vm343_vm7, %v337_v52, 0.0  ;;  %v2443_v56 = vsel %vm343_vm7, %v337_v52, %v2369_v63 }
 0x186   :  { %1630 = vst [vmem:[%s3132_s9 + $0x8] sm:$0xff] %v344_v19  ;;  %368 = vmatmul.f32.vlgmr.msrb.gmra.mxu2 %v2443_v56  ;;  %388 = vmatmul.f32.vlgmr.msrb.gmra.mxu3 %v2443_v56 }
 0x187   :  { %408 = vmatmul.f32.vlgmr.msra.gmra.mxu0 %v2443_v56  ;;  %634 = vmatpush.msrb.mxu2 %v1992_v12 }
 0x188   :  { %715 = vmatpush.msrb.mxu3 %v1921_v0  ;;  %735 = vmatpush.msra.mxu0 %v1926_v1  ;;  %v3181_v0 = vld [vmem:[#allocation6_spill] sm:$0xff]  ;;  %v3182_v1 = vld [vmem:[#allocation11_spill] sm:$0xff] }
 0x189   :  { %635 = vmatpush.msrb.mxu2 %v2000_v13  ;;  %v3189_v13 = vld [vmem:[#allocation14_spill] sm:$0xff] }
 0x18a   :  { %716 = vmatpush.msrb.mxu3 %v1931_v2  ;;  %736 = vmatpush.msra.mxu0 %v1938_v3  ;;  %v3183_v2 = vld [vmem:[#allocation7_spill] sm:$0xff]  ;;  %v3184_v3 = vld [vmem:[#allocation8_spill] sm:$0xff] }
 0x18b   :  { %636 = vmatpush.msrb.mxu2 %v2019_v16 }
 0x18c   :  { %717 = vmatpush.msrb.mxu3 %v1943_v4  ;;  %737 = vmatpush.msra.mxu0 %v1948_v5  ;;  %v3185_v4 = vld [vmem:[#allocation12_spill] sm:$0xff]  ;;  %v3186_v5 = vld [vmem:[#allocation9_spill] sm:$0xff] }
 0x18d   :  { %637 = vmatpush.msrb.mxu2 %v2038_v20 }
 0x18e   :  { %718 = vmatpush.msrb.mxu3 %v1956_v6  ;;  %738 = vmatpush.msra.mxu0 %v1961_v7  ;;  %v3187_v6 = vld [vmem:[#allocation10_spill] sm:$0xff]  ;;  %v1631_v7 = vld [vmem:[%s3125_s2 + $0x30] sm:$0xff] }
 0x18f   :  { %638 = vmatpush.msrb.mxu2 %v2057_v23 }
 0x190   :  { %719 = vmatpush.msrb.mxu3 %v1969_v8  ;;  %739 = vmatpush.msra.mxu0 %v1974_v9  ;;  %v1632_v9 = vld [vmem:[%s3125_s2 + $0x38] sm:$0xff] }
 0x191   :  { %639 = vmatpush.msrb.mxu2 %v2081_v27 }
 0x192   :  { %720 = vmatpush.msrb.mxu3 %v1982_v10  ;;  %740 = vmatpush.msra.mxu0 %v1987_v11  ;;  %v3188_v11 = vld [vmem:[#allocation13_spill] sm:$0xff] }
 0x193   :  { %640 = vmatpush.msrb.mxu2 %v2102_v31 }
 0x194   :  { %721 = vmatpush.msrb.mxu3 %v2005_v14  ;;  %741 = vmatpush.msra.mxu0 %v2010_v15 }
 0x195   :  { %641 = vmatpush.msrb.mxu2 %v2120_v34 }
 0x196   :  { %722 = vmatpush.msrb.mxu3 %v2024_v17  ;;  %742 = vmatpush.msra.mxu0 %v2029_v18 }
 0x197   :  { %642 = vmatpush.msrb.mxu2 %v2140_v37 }
 0x198   :  { %723 = vmatpush.msrb.mxu3 %v2043_v21  ;;  %743 = vmatpush.msra.mxu0 %v2048_v22 }
 0x199   :  { %643 = vmatpush.msrb.mxu2 %v2159_v40 }
 0x19a   :  { %724 = vmatpush.msrb.mxu3 %v2062_v24  ;;  %744 = vmatpush.msra.mxu0 %v2067_v25 }
 0x19b   :  { %644 = vmatpush.msrb.mxu2 %v2179_v44 }
 0x19c   :  { %725 = vmatpush.msrb.mxu3 %v2087_v28  ;;  %745 = vmatpush.msra.mxu0 %v2092_v29 }
 0x19d   :  { %645 = vmatpush.msrb.mxu2 %v2198_v47 }
 0x19e   :  { %726 = vmatpush.msrb.mxu3 %v2107_v32  ;;  %746 = vmatpush.msra.mxu0 %v2112_v33 }
 0x19f   :  { %646 = vmatpush.msrb.mxu2 %v2207_v49 }
 0x1a0   :  { %727 = vmatpush.msrb.mxu3 %v2125_v35  ;;  %747 = vmatpush.msra.mxu0 %v2130_v36 }
 0x1a1   :  { %647 = vmatpush.msrb.mxu2 %v2215_v51 }
 0x1a2   :  { %728 = vmatpush.msrb.mxu3 %v2145_v38  ;;  %748 = vmatpush.msra.mxu0 %v3181_v0 }
 0x1a3   :  { %648 = vmatpush.msrb.mxu2 %v3182_v1 }
 0x1a4   :  { %729 = vmatpush.msrb.mxu3 %v3183_v2  ;;  %749 = vmatpush.msra.mxu0 %v3184_v3 }
 0x1a5   :  { %649 = vmatpush.msrb.mxu2 %v3185_v4 }
 0x1a6   :  { %730 = vmatpush.msrb.mxu3 %v3186_v5  ;;  %750 = vmatpush.msra.mxu0 %v3187_v6 }
 0x204   :  { %v409_v58 = vpop.f32.mrf.mxu0 }
 0x205   :  { %v410_v48 = vadd.f32 %v409_v58, %v3180_v50  ;;  %v2642_v58 = vld [vmem:[%s3126_s3 + $0xc8] sm:$0xff] }
 0x209   :  { %v369_v8 = vpop.f32.mrf.mxu2  ;;  %v389_v10 = vpop.f32.mrf.mxu3 }
 0x20a   :  { %v370_v12 = vadd.f32 %v369_v8, %v3188_v11  ;;  %v390_v14 = vadd.f32 %v389_v10, %v3189_v13 }
 0x20c   :  { %v412_v15 = vadd.f32 %v1631_v7, %v370_v12  ;;  %v432_v16 = vadd.f32 %v1632_v9, %v390_v14  ;;  %v463_v9 = vpop.permute.xlu1 %462 }
 0x20d   :  { %vm464_vm0 = vcmp.eq.s32.totalorder %v463_v9, 1 }
 0x20e   :  { %v1634_v17 = vmul.f32 -1.442695, %v412_v15  ;;  %v1635_v18 = vmul.f32 -1.442695, %v432_v16 }
 0x210   :  { %1704 = vpow2.f32 %v1634_v17  ;;  %v2524_v17 = vld [vmem:[%s3126_s3 + $0x178] sm:$0xff] }
 0x211   :  { %1706 = vpow2.f32 %v1635_v18  ;;  %v2536_v18 = vld [vmem:[%s3126_s3 + $0x170] sm:$0xff] }
 0x216   :  { %v1705_v20 = vpop.eup %1704 }
 0x217   :  { %v1707_v21 = vpop.eup %1706  ;;  %v416_v22 = vadd.f32 1.0, %v1705_v20  ;;  %v2542_v20 = vld [vmem:[%s3126_s3 + $0x160] sm:$0xff] }
 0x218   :  { %v436_v24 = vadd.f32 1.0, %v1707_v21  ;;  %v2548_v21 = vld [vmem:[%s3126_s3 + $0x150] sm:$0xff] }
 0x219   :  { %1708 = vrcp.f32 %v416_v22  ;;  %v428_v39 = vand.u32 2147483648, %v416_v22  ;;  %v426_v43 = vand.u32 2147483647, %v416_v22  ;;  %vm422_vm9 = vweird.f32 %v416_v22 }
 0x21a   :  { %1710 = vrcp.f32 %v436_v24  ;;  %v448_v53 = vand.u32 2147483648, %v436_v24  ;;  %vm442_vm13 = vweird.f32 %v436_v24  ;;  %v446_v30 = vand.u32 2147483647, %v436_v24 }
 0x21b   :  { %v429_v59 = vor.u32 1.1754944e-38, %v428_v39  ;;  %vm427_vm11 = vcmp.eq.f32.partialorder %v426_v43, 8.507059e+37  ;;  %v2597_v39 = vld [vmem:[%s3126_s3 + $0x108] sm:$0xff]  ;;  %v2629_v43 = vld [vmem:[%s3126_s3 + $0xe0] sm:$0xff] }
 0x21c   :  { %v449_v52 = vor.u32 1.1754944e-38, %v448_v53  ;;  %vm447_vm15 = vcmp.eq.f32.partialorder %v446_v30, 8.507059e+37 }
 0x21f   :  { %v1709_v25 = vpop.eup %1708 }
 0x220   :  { %v1711_v28 = vpop.eup %1710  ;;  %v418_v29 = vmul.f32 %v1709_v25, %v416_v22  ;;  %vm423_vm8 = vweird.f32 %v1709_v25  ;;  %v2554_v22 = vld [vmem:[%s3126_s3 + $0x158] sm:$0xff] }
 0x221   :  { %v438_v32 = vmul.f32 %v1711_v28, %v436_v24  ;;  %vm424_vm10 = vmor %vm422_vm9, %vm423_vm8  ;;  %vm443_vm12 = vweird.f32 %v1711_v28  ;;  %v2560_v24 = vld [vmem:[%s3126_s3 + $0x148] sm:$0xff] }
 0x222   :  { %v419_v33 = vsub.f32 1.0, %v418_v29  ;;  %vm444_vm14 = vmor %vm442_vm13, %vm443_vm12  ;;  %v2578_v29 = vld [vmem:[%s3126_s3 + $0x130] sm:$0xff] }
 0x223   :  { %v439_v63 = vsub.f32 1.0, %v438_v32  ;;  %v2584_v32 = vld [vmem:[%s3126_s3 + $0x120] sm:$0xff] }
 0x224   :  { %v420_v41 = vmul.f32 %v1709_v25, %v419_v33  ;;  %v2590_v33 = vld [vmem:[%s3126_s3 + $0x128] sm:$0xff] }
 0x225   :  { %v440_v57 = vmul.f32 %v1711_v28, %v439_v63  ;;  %v2603_v63 = vld [vmem:[%s3126_s3 + $0x110] sm:$0xff] }
 0x226   :  { %v421_v60 = vadd.f32 %v1709_v25, %v420_v41  ;;  %v2616_v41 = vld [vmem:[%s3126_s3 + $0xf8] sm:$0xff] }
 0x227   :  { %v441_v46 = vadd.f32 %v1711_v28, %v440_v57  ;;  %v2655_v57 = vld [vmem:[%s3126_s3 + $0xb0] sm:$0xff] }
 0x228   :  { %v425_v45 = vsel %vm424_vm10, %v1709_v25, %v421_v60  ;;  %v2566_v25 = vld [vmem:[%s3126_s3 + $0x138] sm:$0xff] }
 0x229   :  { %v430_v61 = vsel %vm427_vm11, %v429_v59, %v425_v45  ;;  %v445_v62 = vsel %vm444_vm14, %v1711_v28, %v441_v46  ;;  %v2572_v28 = vld [vmem:[%s3126_s3 + $0x140] sm:$0xff]  ;;  %v2668_v60 = vld [vmem:[%s3126_s3 + $0x98] sm:$0xff] }
 0x22a   :  { %v452_v55 = vmul.f32 %v430_v61, %v410_v48  ;;  %v450_v19 = vsel %vm447_vm15, %v449_v52, %v445_v62  ;;  %v2681_v59 = vld [vmem:[%s3126_s3 + $0x80] sm:$0xff]  ;;  %v2694_v48 = vld [vmem:[%s3126_s3 + $0x68] sm:$0xff] }
 0x22b   :  { %v455_v7 = vsub.f32 1.0, %v450_v19  ;;  %v457_v12 = vmul.f32 %v450_v19, %v2443_v56 }
 0x22c   :  { %v453_v26 = vadd.f32 %v1633_v54, %v452_v55 }
 0x22e   :  { %1712 = vtanh.f32 %v453_v26 }
 0x234   :  { %v1713_v8 = vpop.eup %1712 }
 0x235   :  { %v456_v10 = vmul.f32 %v1713_v8, %v455_v7 }
 0x237   :  { %v458_v14 = vadd.f32 %v457_v12, %v456_v10 }
 0x239   :  { %v465_v15 = vsel %vm464_vm0, %v458_v14, 0.0  ;;  %v2513_v16 = vsel %vm464_vm0, %v458_v14, %v2443_v56  ;;  %v2530_v56 = vld [vmem:[%s3126_s3 + $0x168] sm:$0xff] }
 0x23a   :  { %1636 = vst [vmem:[%s3132_s9 + $0x10] sm:$0xff] %v465_v15  ;;  %489 = vmatmul.f32.vlgmr.msra.gmra.mxu1 %v2513_v16  ;;  %509 = vmatmul.f32.vlgmr.msra.gmra.mxu2 %v2513_v16 }
 0x23b   :  { %529 = vmatmul.f32.vlgmr.msra.gmra.mxu3 %v2513_v16  ;;  %755 = vmatpush.msra.mxu1 %v2524_v17 }
 0x23c   :  { %836 = vmatpush.msra.mxu2 %v2530_v56  ;;  %856 = vmatpush.msra.mxu3 %v2536_v18 }
 0x23d   :  { %756 = vmatpush.msra.mxu1 %v2542_v20 }
 0x23e   :  { %837 = vmatpush.msra.mxu2 %v2548_v21  ;;  %857 = vmatpush.msra.mxu3 %v2554_v22 }
 0x23f   :  { %757 = vmatpush.msra.mxu1 %v2560_v24 }
 0x240   :  { %838 = vmatpush.msra.mxu2 %v2566_v25  ;;  %858 = vmatpush.msra.mxu3 %v2572_v28 }
 0x241   :  { %758 = vmatpush.msra.mxu1 %v2578_v29 }
 0x242   :  { %839 = vmatpush.msra.mxu2 %v2584_v32  ;;  %859 = vmatpush.msra.mxu3 %v2590_v33 }
 0x243   :  { %759 = vmatpush.msra.mxu1 %v2057_v23  ;;  %v2610_v23 = vld [vmem:[%s3126_s3 + $0xf0] sm:$0xff] }
 0x244   :  { %840 = vmatpush.msra.mxu2 %v2597_v39  ;;  %860 = vmatpush.msra.mxu3 %v2603_v63 }
 0x245   :  { %760 = vmatpush.msra.mxu1 %v2081_v27  ;;  %v2623_v27 = vld [vmem:[%s3126_s3 + $0xd8] sm:$0xff] }
 0x246   :  { %841 = vmatpush.msra.mxu2 %v2610_v23  ;;  %861 = vmatpush.msra.mxu3 %v2616_v41 }
 0x247   :  { %761 = vmatpush.msra.mxu1 %v2102_v31  ;;  %v2636_v31 = vld [vmem:[%s3126_s3 + $0xc0] sm:$0xff] }
 0x248   :  { %842 = vmatpush.msra.mxu2 %v2623_v27  ;;  %862 = vmatpush.msra.mxu3 %v2629_v43 }
 0x249   :  { %762 = vmatpush.msra.mxu1 %v2120_v34  ;;  %v2649_v34 = vld [vmem:[%s3126_s3 + $0xa8] sm:$0xff] }
 0x24a   :  { %843 = vmatpush.msra.mxu2 %v2636_v31  ;;  %863 = vmatpush.msra.mxu3 %v2642_v58 }
 0x24b   :  { %763 = vmatpush.msra.mxu1 %v2140_v37  ;;  %v2662_v37 = vld [vmem:[%s3126_s3 + $0x90] sm:$0xff] }
 0x24c   :  { %844 = vmatpush.msra.mxu2 %v2649_v34  ;;  %864 = vmatpush.msra.mxu3 %v2655_v57 }
 0x24d   :  { %764 = vmatpush.msra.mxu1 %v2159_v40  ;;  %v2675_v40 = vld [vmem:[%s3126_s3 + $0x78] sm:$0xff] }
 0x24e   :  { %845 = vmatpush.msra.mxu2 %v2662_v37  ;;  %865 = vmatpush.msra.mxu3 %v2668_v60 }
 0x24f   :  { %765 = vmatpush.msra.mxu1 %v2179_v44  ;;  %v2688_v44 = vld [vmem:[%s3126_s3 + $0x60] sm:$0xff] }
 0x250   :  { %846 = vmatpush.msra.mxu2 %v2675_v40  ;;  %866 = vmatpush.msra.mxu3 %v2681_v59 }
 0x251   :  { %766 = vmatpush.msra.mxu1 %v2198_v47 }
 0x252   :  { %847 = vmatpush.msra.mxu2 %v2688_v44  ;;  %867 = vmatpush.msra.mxu3 %v2694_v48 }
 0x253   :  { %767 = vmatpush.msra.mxu1 %v2207_v49 }
 0x254   :  { %848 = vmatpush.msra.mxu2 %v2125_v35  ;;  %868 = vmatpush.msra.mxu3 %v2130_v36  ;;  %v1637_v35 = vld [vmem:[%s3125_s2 + $0x48] sm:$0xff] }
 0x255   :  { %768 = vmatpush.msra.mxu1 %v2215_v51  ;;  %v1638_v51 = vld [vmem:[%s3125_s2 + $0x50] sm:$0xff] }
 0x256   :  { %849 = vmatpush.msra.mxu2 %v2145_v38  ;;  %869 = vmatpush.msra.mxu3 %v3181_v0 }
 0x257   :  { %769 = vmatpush.msra.mxu1 %v3182_v1 }
 0x258   :  { %850 = vmatpush.msra.mxu2 %v3183_v2  ;;  %870 = vmatpush.msra.mxu3 %v3184_v3 }
 0x259   :  { %770 = vmatpush.msra.mxu1 %v3185_v4 }
 0x25a   :  { %851 = vmatpush.msra.mxu2 %v3186_v5  ;;  %871 = vmatpush.msra.mxu3 %v3187_v6  ;;  %v1798_v6 = vld [vmem:[%s3123_s0] sm:$0xff] }
 0x25b   :  { %vm701_vm1 = vcmp.gt.s32.totalorder %v1798_v6, 4  ;;  %vm822_vm2 = vcmp.gt.s32.totalorder %v1798_v6, 5 }
 0x25c   :  { %v702_v54 = vsel %vm701_vm1, 1, %v3179_v42  ;;  %v823_v30 = vsel %vm822_vm2, 1, %v3179_v42  ;;  %v1639_v42 = vld [vmem:[%s3125_s2 + $0x58] sm:$0xff] }
 0x25d   :  { %704 = vperm.xlu2 %1682, %v702_v54  }
 0x265   :  { %825 = vperm.xlu2 %1682, %v823_v30  }
 0x2b7   :  { %v490_v36 = vpop.f32.mrf.mxu1 }
 0x2b8   :  { %v491_v38 = vadd.f32 %v490_v36, %v3188_v11 }
 0x2ba   :  { %v533_v47 = vadd.f32 %v1637_v35, %v491_v38 }
 0x2bc   :  { %v1640_v49 = vmul.f32 -1.442695, %v533_v47 }
 0x2bd   :  { %v510_v0 = vpop.f32.mrf.mxu2 }
 0x2be   :  { %1714 = vpow2.f32 %v1640_v49  ;;  %v511_v1 = vadd.f32 %v510_v0, %v3189_v13  ;;  %v530_v7 = vpop.f32.mrf.mxu3  ;;  %v1268_v49 = vld [vmem:[%s3124_s1] sm:$0xff] }
 0x2bf   :  { %v531_v14 = vadd.f32 %v530_v7, %v3180_v50  ;;  %1270 = vperm.xlu2 %1682, %v1268_v49  }
 0x2c0   :  { %v553_v2 = vadd.f32 %v1638_v51, %v511_v1 }
 0x2c2   :  { %v1641_v3 = vmul.f32 -1.442695, %v553_v2 }
 0x2c4   :  { %v1715_v4 = vpop.eup %1714  ;;  %1716 = vpow2.f32 %v1641_v3 }
 0x2c5   :  { %v537_v5 = vadd.f32 1.0, %v1715_v4 }
 0x2c7   :  { %1718 = vrcp.f32 %v537_v5  ;;  %v549_v26 = vand.u32 2147483648, %v537_v5  ;;  %v547_v52 = vand.u32 2147483647, %v537_v5  ;;  %vm543_vm4 = vweird.f32 %v537_v5 }
 0x2c9   :  { %v550_v10 = vor.u32 1.1754944e-38, %v549_v26  ;;  %vm548_vm6 = vcmp.eq.f32.partialorder %v547_v52, 8.507059e+37 }
 0x2ca   :  { %v1717_v45 = vpop.eup %1716 }
 0x2cb   :  { %v557_v61 = vadd.f32 1.0, %v1717_v45 }
 0x2cd   :  { %v1719_v46 = vpop.eup %1718  ;;  %1720 = vrcp.f32 %v557_v61  ;;  %v569_v38 = vand.u32 2147483648, %v557_v61  ;;  %v567_v51 = vand.u32 2147483647, %v557_v61  ;;  %vm563_vm8 = vweird.f32 %v557_v61 }
 0x2ce   :  { %v539_v53 = vmul.f32 %v1719_v46, %v537_v5  ;;  %vm544_vm3 = vweird.f32 %v1719_v46 }
 0x2cf   :  { %vm545_vm5 = vmor %vm543_vm4, %vm544_vm3  ;;  %v570_v2 = vor.u32 1.1754944e-38, %v569_v38  ;;  %vm568_vm10 = vcmp.eq.f32.partialorder %v567_v51, 8.507059e+37 }
 0x2d0   :  { %v540_v55 = vsub.f32 1.0, %v539_v53 }
 0x2d2   :  { %v541_v62 = vmul.f32 %v1719_v46, %v540_v55 }
 0x2d3   :  { %v1721_v19 = vpop.eup %1720 }
 0x2d4   :  { %v559_v8 = vmul.f32 %v1721_v19, %v557_v61  ;;  %v542_v9 = vadd.f32 %v1719_v46, %v541_v62  ;;  %vm564_vm7 = vweird.f32 %v1721_v19 }
 0x2d5   :  { %vm565_vm9 = vmor %vm563_vm8, %vm564_vm7 }
 0x2d6   :  { %v560_v12 = vsub.f32 1.0, %v559_v8  ;;  %v546_v15 = vsel %vm545_vm5, %v1719_v46, %v542_v9  ;;  %v584_v46 = vpop.permute.xlu1 %583 }
 0x2d7   :  { %v551_v35 = vsel %vm548_vm6, %v550_v10, %v546_v15  ;;  %vm585_vm11 = vcmp.eq.s32.totalorder %v584_v46, 1 }
 0x2d8   :  { %v561_v36 = vmul.f32 %v1721_v19, %v560_v12  ;;  %v573_v47 = vmul.f32 %v551_v35, %v531_v14 }
 0x2da   :  { %v562_v0 = vadd.f32 %v1721_v19, %v561_v36  ;;  %v574_v1 = vadd.f32 %v1639_v42, %v573_v47 }
 0x2dc   :  { %v566_v3 = vsel %vm565_vm9, %v1721_v19, %v562_v0  ;;  %1722 = vtanh.f32 %v574_v1 }
 0x2dd   :  { %v571_v4 = vsel %vm568_vm10, %v570_v2, %v566_v3 }
 0x2de   :  { %v576_v5 = vsub.f32 1.0, %v571_v4  ;;  %v578_v54 = vmul.f32 %v571_v4, %v2513_v16 }
 0x2e2   :  { %v1723_v6 = vpop.eup %1722 }
 0x2e3   :  { %v577_v45 = vmul.f32 %v1723_v6, %v576_v5  ;;  %v1645_v5 = vld [vmem:[%s3125_s2 + $0x70] sm:$0xff] }
 0x2e5   :  { %v579_v53 = vadd.f32 %v578_v54, %v577_v45 }
 0x2e7   :  { %v586_v55 = vsel %vm585_vm11, %v579_v53, 0.0  ;;  %v2731_v61 = vsel %vm585_vm11, %v579_v53, %v2513_v16  ;;  %v2754_v16 = vld [vmem:[%s3126_s3 + $0x118] sm:$0xff] }
 0x2e8   :  { %1642 = vst [vmem:[%s3132_s9 + $0x18] sm:$0xff] %v586_v55  ;;  %610 = vmatmul.f32.vlgmr.msrb.gmra.mxu0 %v2731_v61  ;;  %630 = vmatmul.f32.vlgmr.msrb.gmra.mxu1 %v2731_v61 }
 0x2e9   :  { %650 = vmatmul.f32.vlgmr.msrb.gmra.mxu2 %v2731_v61  ;;  %876 = vmatpush.msrb.mxu0 %v2524_v17 }
 0x2ea   :  { %957 = vmatpush.msrb.mxu1 %v2530_v56  ;;  %977 = vmatpush.msrb.mxu2 %v2536_v18  ;;  %v2762_v56 = vld [vmem:[%s3126_s3 + $0x100] sm:$0xff]  ;;  %v2770_v18 = vld [vmem:[%s3126_s3 + $0xe8] sm:$0xff] }
 0x2eb   :  { %877 = vmatpush.msrb.mxu0 %v2542_v20 }
 0x2ec   :  { %958 = vmatpush.msrb.mxu1 %v2548_v21  ;;  %978 = vmatpush.msrb.mxu2 %v2554_v22  ;;  %v2778_v21 = vld [vmem:[%s3126_s3 + $0xd0] sm:$0xff]  ;;  %v2786_v22 = vld [vmem:[%s3126_s3 + $0xb8] sm:$0xff] }
 0x2ed   :  { %878 = vmatpush.msrb.mxu0 %v2560_v24 }
 0x2ee   :  { %959 = vmatpush.msrb.mxu1 %v2566_v25  ;;  %979 = vmatpush.msrb.mxu2 %v2572_v28  ;;  %v2794_v25 = vld [vmem:[%s3126_s3 + $0xa0] sm:$0xff]  ;;  %v2802_v28 = vld [vmem:[%s3126_s3 + $0x88] sm:$0xff] }
 0x2ef   :  { %879 = vmatpush.msrb.mxu0 %v2578_v29 }
 0x2f0   :  { %960 = vmatpush.msrb.mxu1 %v2584_v32  ;;  %980 = vmatpush.msrb.mxu2 %v2590_v33  ;;  %v2810_v32 = vld [vmem:[%s3126_s3 + $0x70] sm:$0xff]  ;;  %v2818_v33 = vld [vmem:[%s3126_s3 + $0x58] sm:$0xff] }
 0x2f1   :  { %880 = vmatpush.msrb.mxu0 %v2754_v16 }
 0x2f2   :  { %961 = vmatpush.msrb.mxu1 %v2597_v39  ;;  %981 = vmatpush.msrb.mxu2 %v2603_v63  ;;  %v1808_v39 = vld [vmem:[%s3126_s3 + $0x48] sm:$0xff]  ;;  %v1809_v63 = vld [vmem:[%s3126_s3 + $0x50] sm:$0xff] }
 0x2f3   :  { %881 = vmatpush.msrb.mxu0 %v2762_v56 }
 0x2f4   :  { %962 = vmatpush.msrb.mxu1 %v2610_v23  ;;  %982 = vmatpush.msrb.mxu2 %v2616_v41  ;;  %v2830_v23 = vld [vmem:[%s3126_s3 + $0x40] sm:$0xff]  ;;  %v1811_v41 = vld [vmem:[%s3126_s3 + $0x30] sm:$0xff] }
 0x2f5   :  { %882 = vmatpush.msrb.mxu0 %v2770_v18 }
 0x2f6   :  { %963 = vmatpush.msrb.mxu1 %v2623_v27  ;;  %983 = vmatpush.msrb.mxu2 %v2629_v43  ;;  %v1812_v27 = vld [vmem:[%s3126_s3 + $0x38] sm:$0xff]  ;;  %v2842_v43 = vld [vmem:[%s3126_s3 + $0x28] sm:$0xff] }
 0x2f7   :  { %883 = vmatpush.msrb.mxu0 %v2778_v21 }
 0x2f8   :  { %964 = vmatpush.msrb.mxu1 %v2636_v31  ;;  %984 = vmatpush.msrb.mxu2 %v2642_v58  ;;  %v1814_v31 = vld [vmem:[%s3126_s3 + $0x18] sm:$0xff]  ;;  %v1815_v58 = vld [vmem:[%s3126_s3 + $0x20] sm:$0xff] }
 0x2f9   :  { %884 = vmatpush.msrb.mxu0 %v2786_v22 }
 0x2fa   :  { %965 = vmatpush.msrb.mxu1 %v2649_v34  ;;  %985 = vmatpush.msrb.mxu2 %v2655_v57  ;;  %v2854_v34 = vld [vmem:[%s3126_s3 + $0x10] sm:$0xff]  ;;  %v1817_v57 = vld [vmem:[%s3126_s3] sm:$0xff] }
 0x2fb   :  { %885 = vmatpush.msrb.mxu0 %v2794_v25 }
 0x2fc   :  { %966 = vmatpush.msrb.mxu1 %v2662_v37  ;;  %986 = vmatpush.msrb.mxu2 %v2668_v60  ;;  %v1818_v37 = vld [vmem:[%s3126_s3 + $0x8] sm:$0xff]  ;;  %v1643_v60 = vld [vmem:[%s3125_s2 + $0x60] sm:$0xff] }
 0x2fd   :  { %886 = vmatpush.msrb.mxu0 %v2802_v28 }
 0x2fe   :  { %967 = vmatpush.msrb.mxu1 %v2675_v40  ;;  %987 = vmatpush.msrb.mxu2 %v2681_v59  ;;  %v1644_v59 = vld [vmem:[%s3125_s2 + $0x68] sm:$0xff] }
 0x2ff   :  { %887 = vmatpush.msrb.mxu0 %v2810_v32 }
 0x300   :  { %968 = vmatpush.msrb.mxu1 %v2688_v44  ;;  %988 = vmatpush.msrb.mxu2 %v2694_v48 }
 0x301   :  { %888 = vmatpush.msrb.mxu0 %v2818_v33 }
 0x302   :  { %969 = vmatpush.msrb.mxu1 %v1808_v39  ;;  %989 = vmatpush.msrb.mxu2 %v1809_v63 }
 0x303   :  { %889 = vmatpush.msrb.mxu0 %v2830_v23 }
 0x304   :  { %970 = vmatpush.msrb.mxu1 %v1811_v41  ;;  %990 = vmatpush.msrb.mxu2 %v1812_v27 }
 0x305   :  { %890 = vmatpush.msrb.mxu0 %v2842_v43 }
 0x306   :  { %971 = vmatpush.msrb.mxu1 %v1814_v31  ;;  %991 = vmatpush.msrb.mxu2 %v1815_v58  ;;  %v705_v58 = vpop.permute.xlu2 %704 }
 0x307   :  { %891 = vmatpush.msrb.mxu0 %v2854_v34  ;;  %vm706_vm4 = vcmp.eq.s32.totalorder %v705_v58, 1 }
 0x308   :  { %972 = vmatpush.msrb.mxu1 %v1817_v57  ;;  %992 = vmatpush.msrb.mxu2 %v1818_v37 }
 0x365   :  { %v611_v40 = vpop.f32.mrf.mxu0  ;;  %v631_v44 = vpop.f32.mrf.mxu1 }
 0x366   :  { %v612_v48 = vadd.f32 %v611_v40, %v3188_v11  ;;  %v632_v30 = vadd.f32 %v631_v44, %v3189_v13 }
 0x368   :  { %v654_v26 = vadd.f32 %v1643_v60, %v612_v48  ;;  %v674_v62 = vadd.f32 %v1644_v59, %v632_v30 }
 0x36a   :  { %v1646_v52 = vmul.f32 -1.442695, %v654_v26  ;;  %v1647_v19 = vmul.f32 -1.442695, %v674_v62 }
 0x36c   :  { %1724 = vpow2.f32 %v1646_v52  ;;  %v651_v51 = vpop.f32.mrf.mxu2 }
 0x36d   :  { %1726 = vpow2.f32 %v1647_v19  ;;  %v652_v3 = vadd.f32 %v651_v51, %v3180_v50 }
 0x372   :  { %v1725_v7 = vpop.eup %1724 }
 0x373   :  { %v1727_v8 = vpop.eup %1726  ;;  %v658_v9 = vadd.f32 1.0, %v1725_v7 }
 0x374   :  { %v678_v10 = vadd.f32 1.0, %v1727_v8 }
 0x375   :  { %1728 = vrcp.f32 %v658_v9  ;;  %v670_v36 = vand.u32 2147483648, %v658_v9  ;;  %v668_v49 = vand.u32 2147483647, %v658_v9  ;;  %vm664_vm13 = vweird.f32 %v658_v9 }
 0x376   :  { %1730 = vrcp.f32 %v678_v10  ;;  %v690_v46 = vand.u32 2147483648, %v678_v10  ;;  %vm684_vm1 = vweird.f32 %v678_v10  ;;  %v688_v53 = vand.u32 2147483647, %v678_v10 }
 0x377   :  { %v671_v2 = vor.u32 1.1754944e-38, %v670_v36  ;;  %vm669_vm15 = vcmp.eq.f32.partialorder %v668_v49, 8.507059e+37 }
 0x378   :  { %v691_v63 = vor.u32 1.1754944e-38, %v690_v46  ;;  %vm689_vm3 = vcmp.eq.f32.partialorder %v688_v53, 8.507059e+37  ;;  %v1655_v46 = vld [vmem:[%s3125_s2 + $0x90] sm:$0xff] }
 0x37b   :  { %v1729_v12 = vpop.eup %1728 }
 0x37c   :  { %v1731_v14 = vpop.eup %1730  ;;  %v660_v15 = vmul.f32 %v1729_v12, %v658_v9  ;;  %vm665_vm12 = vweird.f32 %v1729_v12 }
 0x37d   :  { %v680_v42 = vmul.f32 %v1731_v14, %v678_v10  ;;  %vm666_vm14 = vmor %vm664_vm13, %vm665_vm12  ;;  %vm685_vm0 = vweird.f32 %v1731_v14 }
 0x37e   :  { %v661_v35 = vsub.f32 1.0, %v660_v15  ;;  %vm686_vm2 = vmor %vm684_vm1, %vm685_vm0  ;;  %v1651_v15 = vld [vmem:[%s3125_s2 + $0x88] sm:$0xff] }
 0x37f   :  { %v681_v38 = vsub.f32 1.0, %v680_v42 }
 0x380   :  { %v662_v47 = vmul.f32 %v1729_v12, %v661_v35 }
 0x381   :  { %v682_v0 = vmul.f32 %v1731_v14, %v681_v38 }
 0x382   :  { %v663_v1 = vadd.f32 %v1729_v12, %v662_v47 }
 0x383   :  { %v683_v45 = vadd.f32 %v1731_v14, %v682_v0 }
 0x384   :  { %v667_v4 = vsel %vm666_vm14, %v1729_v12, %v663_v1 }
 0x385   :  { %v672_v6 = vsel %vm669_vm15, %v671_v2, %v667_v4  ;;  %v687_v39 = vsel %vm686_vm2, %v1731_v14, %v683_v45 }
 0x386   :  { %v694_v54 = vmul.f32 %v672_v6, %v652_v3  ;;  %v692_v41 = vsel %vm689_vm3, %v691_v63, %v687_v39 }
 0x387   :  { %v697_v27 = vsub.f32 1.0, %v692_v41  ;;  %v699_v37 = vmul.f32 %v692_v41, %v2731_v61 }
 0x388   :  { %v695_v55 = vadd.f32 %v1645_v5, %v694_v54  ;;  %v826_v5 = vpop.permute.xlu2 %825 }
 0x389   :  { %vm827_vm13 = vcmp.eq.s32.totalorder %v826_v5, 1 }
 0x38a   :  { %1732 = vtanh.f32 %v695_v55  ;;  %v1656_v55 = vld [vmem:[%s3125_s2 + $0x98] sm:$0xff] }
 0x390   :  { %v1733_v31 = vpop.eup %1732 }
 0x391   :  { %v698_v57 = vmul.f32 %v1733_v31, %v697_v27 }
 0x393   :  { %v700_v60 = vadd.f32 %v699_v37, %v698_v57 }
 0x395   :  { %v707_v40 = vsel %vm706_vm4, %v700_v60, 0.0  ;;  %v2877_v59 = vsel %vm706_vm4, %v700_v60, %v2731_v61 }
 0x396   :  { %1648 = vst [vmem:[%s3132_s9 + $0x20] sm:$0xff] %v707_v40  ;;  %731 = vmatmul.f32.vlgmr.msrb.gmra.mxu3 %v2877_v59  ;;  %751 = vmatmul.f32.vlgmr.msra.gmra.mxu0 %v2877_v59 }
 0x397   :  { %771 = vmatmul.f32.vlgmr.msra.gmra.mxu1 %v2877_v59  ;;  %997 = vmatpush.msrb.mxu3 %v2524_v17  ;;  %v1650_v17 = vld [vmem:[%s3125_s2 + $0x80] sm:$0xff] }
 0x399   :  { %998 = vmatpush.msrb.mxu3 %v2542_v20 }
 0x39b   :  { %999 = vmatpush.msrb.mxu3 %v2560_v24 }
 0x39d   :  { %1000 = vmatpush.msrb.mxu3 %v2578_v29 }
 0x39f   :  { %1001 = vmatpush.msrb.mxu3 %v2754_v16  ;;  %v1649_v16 = vld [vmem:[%s3125_s2 + $0x78] sm:$0xff] }
 0x3a1   :  { %1002 = vmatpush.msrb.mxu3 %v2762_v56 }
 0x3a3   :  { %1003 = vmatpush.msrb.mxu3 %v2770_v18 }
 0x3a5   :  { %1004 = vmatpush.msrb.mxu3 %v2778_v21 }
 0x3a7   :  { %1005 = vmatpush.msrb.mxu3 %v2786_v22 }
 0x3a9   :  { %1006 = vmatpush.msrb.mxu3 %v2794_v25 }
 0x3ab   :  { %1007 = vmatpush.msrb.mxu3 %v2802_v28 }
 0x3ad   :  { %1008 = vmatpush.msrb.mxu3 %v2810_v32 }
 0x3af   :  { %1009 = vmatpush.msrb.mxu3 %v2818_v33 }
 0x3b1   :  { %1010 = vmatpush.msrb.mxu3 %v2830_v23 }
 0x3b3   :  { %1011 = vmatpush.msrb.mxu3 %v2842_v43 }
 0x3b5   :  { %1012 = vmatpush.msrb.mxu3 %v2854_v34 }
 0x413   :  { %v752_v20 = vpop.f32.mrf.mxu0 }
 0x414   :  { %v753_v24 = vadd.f32 %v752_v20, %v3189_v13  ;;  %v772_v7 = vpop.f32.mrf.mxu1 }
 0x415   :  { %v773_v10 = vadd.f32 %v772_v7, %v3180_v50 }
 0x416   :  { %v795_v29 = vadd.f32 %v1650_v17, %v753_v24 }
 0x418   :  { %v1653_v61 = vmul.f32 -1.442695, %v795_v29 }
 0x419   :  { %v732_v56 = vpop.f32.mrf.mxu3 }
 0x41a   :  { %1734 = vpow2.f32 %v1653_v61  ;;  %v733_v18 = vadd.f32 %v732_v56, %v3188_v11 }
 0x41c   :  { %v775_v21 = vadd.f32 %v1649_v16, %v733_v18 }
 0x41e   :  { %v1652_v22 = vmul.f32 -1.442695, %v775_v21 }
 0x420   :  { %v1735_v25 = vpop.eup %1734  ;;  %1736 = vpow2.f32 %v1652_v22 }
 0x421   :  { %v799_v28 = vadd.f32 1.0, %v1735_v25 }
 0x423   :  { %1738 = vrcp.f32 %v799_v28  ;;  %v811_v35 = vand.u32 2147483648, %v799_v28  ;;  %vm805_vm10 = vweird.f32 %v799_v28  ;;  %v809_v38 = vand.u32 2147483647, %v799_v28 }
 0x425   :  { %v812_v51 = vor.u32 1.1754944e-38, %v811_v35  ;;  %vm810_vm12 = vcmp.eq.f32.partialorder %v809_v38, 8.507059e+37 }
 0x426   :  { %v1737_v32 = vpop.eup %1736 }
 0x427   :  { %v779_v33 = vadd.f32 1.0, %v1737_v32 }
 0x429   :  { %1740 = vrcp.f32 %v779_v33  ;;  %v1739_v23 = vpop.eup %1738  ;;  %v791_v26 = vand.u32 2147483648, %v779_v33  ;;  %v789_v52 = vand.u32 2147483647, %v779_v33  ;;  %vm785_vm6 = vweird.f32 %v779_v33 }
 0x42a   :  { %v801_v43 = vmul.f32 %v1739_v23, %v799_v28  ;;  %vm806_vm9 = vweird.f32 %v1739_v23 }
 0x42b   :  { %v792_v9 = vor.u32 1.1754944e-38, %v791_v26  ;;  %vm790_vm8 = vcmp.eq.f32.partialorder %v789_v52, 8.507059e+37  ;;  %vm807_vm11 = vmor %vm805_vm10, %vm806_vm9 }
 0x42c   :  { %v802_v48 = vsub.f32 1.0, %v801_v43 }
 0x42e   :  { %v803_v19 = vmul.f32 %v1739_v23, %v802_v48 }
 0x42f   :  { %v1741_v34 = vpop.eup %1740 }
 0x430   :  { %v781_v44 = vmul.f32 %v1741_v34, %v779_v33  ;;  %vm786_vm5 = vweird.f32 %v1741_v34  ;;  %v804_v42 = vadd.f32 %v1739_v23, %v803_v19 }
 0x431   :  { %vm787_vm7 = vmor %vm785_vm6, %vm786_vm5 }
 0x432   :  { %v782_v30 = vsub.f32 1.0, %v781_v44  ;;  %v808_v49 = vsel %vm807_vm11, %v1739_v23, %v804_v42 }
 0x433   :  { %v813_v0 = vsel %vm810_vm12, %v812_v51, %v808_v49 }
 0x434   :  { %v783_v62 = vmul.f32 %v1741_v34, %v782_v30  ;;  %v818_v1 = vsub.f32 1.0, %v813_v0  ;;  %v820_v4 = vmul.f32 %v813_v0, %v2877_v59  ;;  %v1662_v0 = vld [vmem:[%s3125_s2 + $0xb0] sm:$0xff] }
 0x436   :  { %v784_v8 = vadd.f32 %v1741_v34, %v783_v62 }
 0x438   :  { %v788_v12 = vsel %vm787_vm7, %v1741_v34, %v784_v8  ;;  %v1657_v34 = vld [vmem:[%s3125_s2 + $0xa0] sm:$0xff] }
 0x439   :  { %v793_v14 = vsel %vm790_vm8, %v792_v9, %v788_v12 }
 0x43a   :  { %v815_v36 = vmul.f32 %v793_v14, %v773_v10  ;;  %v947_v10 = vpop.permute.xlu0 %946 }
 0x43b   :  { %vm948_vm6 = vcmp.eq.s32.totalorder %v947_v10, 1 }
 0x43c   :  { %v816_v47 = vadd.f32 %v1651_v15, %v815_v36  ;;  %v1661_v36 = vld [vmem:[%s3125_s2 + $0xa8] sm:$0xff] }
 0x43e   :  { %1742 = vtanh.f32 %v816_v47 }
 0x444   :  { %v1743_v2 = vpop.eup %1742 }
 0x445   :  { %v819_v3 = vmul.f32 %v1743_v2, %v818_v1 }
 0x447   :  { %v821_v6 = vadd.f32 %v820_v4, %v819_v3  ;;  %v1076_v4 = vld [vmem:[%s3128_s5 + $0x8] sm:$0xff] }
 0x448   :  { %1341 = vmatpush.msra.mxu0 %v1076_v4 }
 0x449   :  { %v828_v45 = vsel %vm827_vm13, %v821_v6, 0.0  ;;  %v2915_v54 = vsel %vm827_vm13, %v821_v6, %v2877_v59 }
 0x44a   :  { %1654 = vst [vmem:[%s3132_s9 + $0x28] sm:$0xff] %v828_v45  ;;  %852 = vmatmul.f32.vlgmr.msra.gmra.mxu2 %v2915_v54  ;;  %872 = vmatmul.f32.vlgmr.msra.gmra.mxu3 %v2915_v54 }
 0x44b   :  { %892 = vmatmul.f32.vlgmr.msrb.gmra.mxu0 %v2915_v54  ;;  %1120 = vmatpush.xpose.msra.mxu2 %v1076_v4 }
 0x4c8   :  { %v893_v22 = vpop.f32.mrf.mxu0 }
 0x4c9   :  { %v894_v33 = vadd.f32 %v893_v22, %v3180_v50 }
 0x4cd   :  { %v853_v53 = vpop.f32.mrf.mxu2  ;;  %v873_v39 = vpop.f32.mrf.mxu3 }
 0x4ce   :  { %v854_v63 = vadd.f32 %v853_v53, %v3188_v11  ;;  %v874_v41 = vadd.f32 %v873_v39, %v3189_v13 }
 0x4d0   :  { %v896_v27 = vadd.f32 %v1655_v46, %v854_v63  ;;  %v916_v31 = vadd.f32 %v1656_v55, %v874_v41  ;;  %v2968_v46 = vld [vmem:[%s3128_s5 + $0x28] sm:$0xff]  ;;  %v2974_v55 = vld [vmem:[%s3128_s5 + $0x38] sm:$0xff]  ;;  %v2980_v63 = vld [vmem:[%s3128_s5 + $0x20] sm:$0xff] }
 0x4d1   :  { %v2985_v41 = vld [vmem:[%s3128_s5 + $0x30] sm:$0xff] }
 0x4d2   :  { %v1658_v58 = vmul.f32 -1.442695, %v896_v27  ;;  %v1659_v57 = vmul.f32 -1.442695, %v916_v31 }
 0x4d4   :  { %1744 = vpow2.f32 %v1658_v58 }
 0x4d5   :  { %1746 = vpow2.f32 %v1659_v57  ;;  %v1084_v57 = vld [vmem:[%s3128_s5 + $0x48] sm:$0xff] }
 0x4da   :  { %v1745_v37 = vpop.eup %1744 }
 0x4db   :  { %v1747_v60 = vpop.eup %1746  ;;  %v900_v40 = vadd.f32 1.0, %v1745_v37 }
 0x4dc   :  { %v920_v59 = vadd.f32 1.0, %v1747_v60 }
 0x4dd   :  { %1748 = vrcp.f32 %v900_v40  ;;  %v912_v16 = vand.u32 2147483648, %v900_v40  ;;  %v910_v21 = vand.u32 2147483647, %v900_v40  ;;  %vm906_vm15 = vweird.f32 %v900_v40 }
 0x4de   :  { %1750 = vrcp.f32 %v920_v59  ;;  %v932_v30 = vand.u32 2147483648, %v920_v59  ;;  %vm926_vm3 = vweird.f32 %v920_v59  ;;  %v930_v26 = vand.u32 2147483647, %v920_v59 }
 0x4df   :  { %v913_v32 = vor.u32 1.1754944e-38, %v912_v16  ;;  %vm911_vm1 = vcmp.eq.f32.partialorder %v910_v21, 8.507059e+37  ;;  %v1085_v16 = vld [vmem:[%s3128_s5 + $0x50] sm:$0xff] }
 0x4e0   :  { %v933_v19 = vor.u32 1.1754944e-38, %v932_v30  ;;  %vm931_vm5 = vcmp.eq.f32.partialorder %v930_v26, 8.507059e+37 }
 0x4e3   :  { %v1749_v17 = vpop.eup %1748 }
 0x4e4   :  { %v1751_v20 = vpop.eup %1750  ;;  %v902_v24 = vmul.f32 %v1749_v17, %v900_v40  ;;  %vm907_vm14 = vweird.f32 %v1749_v17 }
 0x4e5   :  { %v922_v29 = vmul.f32 %v1751_v20, %v920_v59  ;;  %vm908_vm0 = vmor %vm906_vm15, %vm907_vm14  ;;  %vm927_vm2 = vweird.f32 %v1751_v20  ;;  %v1086_v59 = vld [vmem:[%s3128_s5 + $0x58] sm:$0xff] }
 0x4e6   :  { %v903_v61 = vsub.f32 1.0, %v902_v24  ;;  %vm928_vm4 = vmor %vm926_vm3, %vm927_vm2  ;;  %vm1288_vm2 = vcmask 1043459   ;;  %vm1291_vm3 = vcmask 1044484  }
 0x4e7   :  { %v923_v56 = vsub.f32 1.0, %v922_v29 }
 0x4e8   :  { %v904_v18 = vmul.f32 %v1749_v17, %v903_v61 }
 0x4e9   :  { %v924_v25 = vmul.f32 %v1751_v20, %v923_v56 }
 0x4ea   :  { %v905_v28 = vadd.f32 %v1749_v17, %v904_v18 }
 0x4eb   :  { %v925_v44 = vadd.f32 %v1751_v20, %v924_v25  ;;  %v1663_v25 = vld [vmem:[%s3125_s2 + $0xb8] sm:$0xff] }
 0x4ec   :  { %v909_v23 = vsel %vm908_vm0, %v1749_v17, %v905_v28  ;;  %v1083_v17 = vld [vmem:[%s3128_s5 + $0x40] sm:$0xff]  ;;  %vm1282_vm0 = vcmask 1041409  }
 0x4ed   :  { %v914_v43 = vsel %vm911_vm1, %v913_v32, %v909_v23  ;;  %v929_v52 = vsel %vm928_vm4, %v1751_v20, %v925_v44  ;;  %vm1285_vm1 = vcmask 1042434   ;;  %vm1294_vm4 = vcmask 1045509  }
 0x4ee   :  { %v936_v48 = vmul.f32 %v914_v43, %v894_v33  ;;  %v934_v7 = vsel %vm931_vm5, %v933_v19, %v929_v52  ;;  %v1068_v52 = vpop.permute.xlu1 %1067  ;;  %vm1297_vm5 = vcmask 1046534  }
 0x4ef   :  { %v939_v8 = vsub.f32 1.0, %v934_v7  ;;  %v941_v14 = vmul.f32 %v934_v7, %v2915_v54  ;;  %vm1069_vm15 = vcmp.eq.s32.totalorder %v1068_v52, 1 }
 0x4f0   :  { %v937_v62 = vadd.f32 %v1657_v34, %v936_v48 }
 0x4f2   :  { %1752 = vtanh.f32 %v937_v62 }
 0x4f8   :  { %v1753_v9 = vpop.eup %1752 }
 0x4f9   :  { %v940_v12 = vmul.f32 %v1753_v9, %v939_v8 }
 0x4fb   :  { %v942_v15 = vadd.f32 %v941_v14, %v940_v12 }
 0x4fd   :  { %v949_v42 = vsel %vm948_vm6, %v942_v15, 0.0  ;;  %v2937_v35 = vsel %vm948_vm6, %v942_v15, %v2915_v54  ;;  %v1077_v54 = vld [vmem:[%s3128_s5 + $0x10] sm:$0xff]  ;;  %v1088_v15 = vld [vmem:[%s3128_s5 + $0x68] sm:$0xff]  ;;  %vm1300_vm6 = vcmask 1047559  }
 0x4fe   :  { %1660 = vst [vmem:[%s3132_s9 + $0x30] sm:$0xff] %v949_v42  ;;  %973 = vmatmul.f32.vlgmr.msrb.gmra.mxu1 %v2937_v35  ;;  %993 = vmatmul.f32.vlgmr.msrb.gmra.mxu2 %v2937_v35 }
 0x4ff   :  { %1013 = vmatmul.f32.vlgmr.msrb.gmra.mxu3 %v2937_v35 }
 0x57b   :  { %v974_v38 = vpop.f32.mrf.mxu1 }
 0x57c   :  { %v975_v47 = vadd.f32 %v974_v38, %v3188_v11  ;;  %v1078_v11 = vld [vmem:[%s3128_s5 + $0x18] sm:$0xff]  ;;  %v1089_v38 = vld [vmem:[%s3128_s5 + $0x70] sm:$0xff] }
 0x57d   :  { %1140 = vmatpush.xpose.msra.mxu3 %v1078_v11  ;;  %1363 = vmatpush.msra.mxu1 %v1078_v11 }
 0x57e   :  { %v1017_v49 = vadd.f32 %v1661_v36, %v975_v47  ;;  %v1087_v36 = vld [vmem:[%s3128_s5 + $0x60] sm:$0xff] }
 0x57f   :  { %1364 = vmatpush.msra.mxu1 %v1077_v54 }
 0x580   :  { %v1664_v51 = vmul.f32 -1.442695, %v1017_v49 }
 0x581   :  { %v994_v1 = vpop.f32.mrf.mxu2  ;;  %1141 = vmatpush.xpose.msra.mxu3 %v1077_v54  ;;  %1451 = vmatpush.msrb.mxu1 %v1086_v59 }
 0x582   :  { %1754 = vpow2.f32 %v1664_v51  ;;  %v995_v2 = vadd.f32 %v994_v1, %v3189_v13  ;;  %v1075_v13 = vld [vmem:[%s3128_s5] sm:$0xff]  ;;  %v1014_v24 = vpop.f32.mrf.mxu3 }
 0x583   :  { %1121 = vmatpush.xpose.msra.mxu2 %v1075_v13  ;;  %1342 = vmatpush.msra.mxu0 %v1075_v13  ;;  %v1015_v21 = vadd.f32 %v1014_v24, %v3180_v50 }
 0x584   :  { %v1037_v3 = vadd.f32 %v1662_v0, %v995_v2  ;;  %1452 = vmatpush.msrb.mxu1 %v1085_v16 }
 0x585   :  { %1180 = vmatpush.xpose.msrb.mxu3 %v2974_v55  ;;  %1429 = vmatpush.msrb.mxu0 %v1084_v57 }
 0x586   :  { %v1665_v5 = vmul.f32 -1.442695, %v1037_v3 }
 0x587   :  { %1160 = vmatpush.xpose.msrb.mxu2 %v2968_v46  ;;  %1430 = vmatpush.msrb.mxu0 %v1083_v17 }
 0x588   :  { %v1755_v6 = vpop.eup %1754  ;;  %1756 = vpow2.f32 %v1665_v5 }
 0x589   :  { %v1021_v45 = vadd.f32 1.0, %v1755_v6  ;;  %1181 = vmatpush.xpose.msrb.mxu3 %v2985_v41 }
 0x58b   :  { %1758 = vrcp.f32 %v1021_v45  ;;  %1161 = vmatpush.xpose.msrb.mxu2 %v2980_v63  ;;  %v1033_v37 = vand.u32 2147483648, %v1021_v45  ;;  %v1031_v40 = vand.u32 2147483647, %v1021_v45  ;;  %vm1027_vm8 = vweird.f32 %v1021_v45 }
 0x58d   :  { %v1034_v56 = vor.u32 1.1754944e-38, %v1033_v37  ;;  %vm1032_vm10 = vcmp.eq.f32.partialorder %v1031_v40, 8.507059e+37 }
 0x58e   :  { %v1757_v53 = vpop.eup %1756 }
 0x58f   :  { %v1041_v39 = vadd.f32 1.0, %v1757_v53 }
 0x591   :  { %v1759_v27 = vpop.eup %1758  ;;  %1760 = vrcp.f32 %v1041_v39  ;;  %v1053_v33 = vand.u32 2147483648, %v1041_v39  ;;  %v1051_v43 = vand.u32 2147483647, %v1041_v39  ;;  %vm1047_vm12 = vweird.f32 %v1041_v39 }
 0x592   :  { %v1023_v31 = vmul.f32 %v1759_v27, %v1021_v45  ;;  %vm1028_vm7 = vweird.f32 %v1759_v27 }
 0x593   :  { %vm1029_vm9 = vmor %vm1027_vm8, %vm1028_vm7  ;;  %v1054_v48 = vor.u32 1.1754944e-38, %v1053_v33  ;;  %vm1052_vm14 = vcmp.eq.f32.partialorder %v1051_v43, 8.507059e+37  ;;  %vm1304_vm7 = vcmask 130048   ;;  %v1531_v43 = vld [vmem:[#allocation2 + $0x70] sm:$0xff] }
 0x594   :  { %v1024_v58 = vsub.f32 1.0, %v1023_v31 }
 0x596   :  { %v1025_v60 = vmul.f32 %v1759_v27, %v1024_v58 }
 0x597   :  { %v1761_v20 = vpop.eup %1760 }
 0x598   :  { %v1043_v29 = vmul.f32 %v1761_v20, %v1041_v39  ;;  %v1026_v61 = vadd.f32 %v1759_v27, %v1025_v60  ;;  %vm1048_vm11 = vweird.f32 %v1761_v20 }
 0x599   :  { %vm1049_vm13 = vmor %vm1047_vm12, %vm1048_vm11 }
 0x59a   :  { %v1044_v18 = vsub.f32 1.0, %v1043_v29  ;;  %v1030_v22 = vsel %vm1029_vm9, %v1759_v27, %v1026_v61 }
 0x59b   :  { %v1035_v28 = vsel %vm1032_vm10, %v1034_v56, %v1030_v22 }
 0x59c   :  { %v1045_v32 = vmul.f32 %v1761_v20, %v1044_v18  ;;  %v1057_v23 = vmul.f32 %v1035_v28, %v1015_v21  ;;  %v1532_v28 = vld [vmem:[#allocation2 + $0x78] sm:$0xff] }
 0x59e   :  { %v1046_v34 = vadd.f32 %v1761_v20, %v1045_v32  ;;  %v1058_v44 = vadd.f32 %v1663_v25, %v1057_v23 }
 0x5a0   :  { %v1050_v30 = vsel %vm1049_vm13, %v1761_v20, %v1046_v34  ;;  %1762 = vtanh.f32 %v1058_v44  ;;  %v1516_v34 = vld [vmem:[%s3129_s6 + $0x78] sm:$0xff]  ;;  %v1530_v44 = vld [vmem:[#allocation2 + $0x68] sm:$0xff] }
 0x5a1   :  { %v1055_v50 = vsel %vm1052_vm14, %v1054_v48, %v1050_v30  ;;  %v1515_v48 = vld [vmem:[%s3129_s6 + $0x70] sm:$0xff]  ;;  %v1529_v30 = vld [vmem:[#allocation2 + $0x60] sm:$0xff] }
 0x5a2   :  { %v1060_v26 = vsub.f32 1.0, %v1055_v50  ;;  %v1062_v7 = vmul.f32 %v1055_v50, %v2937_v35  ;;  %v1514_v50 = vld [vmem:[%s3129_s6 + $0x68] sm:$0xff] }
 0x5a6   :  { %v1763_v62 = vpop.eup %1762 }
 0x5a7   :  { %v1061_v19 = vmul.f32 %v1763_v62, %v1060_v26  ;;  %v1528_v62 = vld [vmem:[#allocation2 + $0x58] sm:$0xff] }
 0x5a9   :  { %v1063_v8 = vadd.f32 %v1062_v7, %v1061_v19  ;;  %v1527_v7 = vld [vmem:[#allocation2 + $0x50] sm:$0xff] }
 0x5ab   :  { %v1070_v9 = vsel %vm1069_vm15, %v1063_v8, 0.0  ;;  %v3007_v10 = vsel %vm1069_vm15, %v1063_v8, %v2937_v35  ;;  %v1090_v35 = vld [vmem:[%s3128_s5 + $0x78] sm:$0xff] }
 0x5ac   :  { %1666 = vst [vmem:[%s3132_s9 + $0x38] sm:$0xff] %v1070_v9  ;;  %1122 = vmatmul.f32.vlgmr.msra.gmra.mxu2 %v3007_v10  ;;  %v1092_v12 = vrot.slane %v3007_v10, 1  ;;  %v1093_v14 = vrot.slane %v3007_v10, 2  ;;  %v1094_v42 = vrot.slane %v3007_v10, 3  ;;  %v1095_v47 = vrot.slane %v3007_v10, 4  ;;  %v1513_v9 = vld [vmem:[%s3129_s6 + $0x60] sm:$0xff] }
 0x5ad   :  { %1074 = vst [vmem:[%s3133_s10] sm:$0xff] %v3007_v10  ;;  %1200 = vmatpush.xpose.msra.mxu2 %v1084_v57  ;;  %v1096_v49 = vrot.slane %v3007_v10, 5  ;;  %v1097_v51 = vrot.slane %v3007_v10, 6  ;;  %v1098_v0 = vrot.slane %v3007_v10, 7  ;;  %v1271_v57 = vpop.permute.xlu2 %1270 }
 0x5ae   :  { %1142 = vmatmul.f32.vlgmr.msra.gmra.mxu3 %v1092_v12  ;;  %v1526_v12 = vld [vmem:[#allocation2 + $0x48] sm:$0xff] }
 0x5af   :  { %1220 = vmatpush.xpose.msra.mxu3 %v1086_v59 }
 0x5b1   :  { %1201 = vmatpush.xpose.msra.mxu2 %v1083_v17 }
 0x5b3   :  { %1221 = vmatpush.xpose.msra.mxu3 %v1085_v16 }
 0x5b4   :  { %1162 = vmatmul.f32.vlgmr.msrb.gmra.mxu2 %v1093_v14  ;;  %v1512_v14 = vld [vmem:[%s3129_s6 + $0x58] sm:$0xff] }
 0x5b5   :  { %1240 = vmatpush.xpose.msrb.mxu2 %v1088_v15 }
 0x5b6   :  { %1182 = vmatmul.f32.vlgmr.msrb.gmra.mxu3 %v1094_v42  ;;  %v1524_v42 = vld [vmem:[#allocation2 + $0x38] sm:$0xff] }
 0x5b7   :  { %1260 = vmatpush.xpose.msrb.mxu3 %v1090_v35 }
 0x5b9   :  { %1241 = vmatpush.xpose.msrb.mxu2 %v1087_v36 }
 0x5bb   :  { %1261 = vmatpush.xpose.msrb.mxu3 %v1089_v38 }
 0x5bc   :  { %1202 = vmatmul.f32.vlgmr.msra.gmra.mxu2 %v1095_v47  ;;  %v1520_v47 = vld [vmem:[#allocation2 + $0x18] sm:$0xff] }
 0x5bd   :  { %1385 = vmatpush.msra.mxu2 %v2968_v46 }
 0x5be   :  { %1222 = vmatmul.f32.vlgmr.msra.gmra.mxu3 %v1096_v49  ;;  %v1519_v49 = vld [vmem:[#allocation2 + $0x10] sm:$0xff] }
 0x5bf   :  { %1407 = vmatpush.msra.mxu3 %v2974_v55  ;;  %1386 = vmatpush.msra.mxu2 %v2980_v63  ;;  %v1266_v55 = vlaneseq }
 0x5c1   :  { %1408 = vmatpush.msra.mxu3 %v2985_v41  ;;  %v1267_v31 = vand.u32 127, %v1266_v55 }
 0x5c3   :  { %vm1272_vm8 = vcmp.lt.s32.totalorder %v1267_v31, %v1271_v57 }
 0x5c4   :  { %1242 = vmatmul.f32.vlgmr.msrb.gmra.mxu2 %v1097_v51  ;;  %v1518_v51 = vld [vmem:[#allocation2 + $0x8] sm:$0xff] }
 0x5c5   :  { %1473 = vmatpush.msrb.mxu2 %v1088_v15  ;;  %v1525_v15 = vld [vmem:[#allocation2 + $0x40] sm:$0xff] }
 0x5c6   :  { %1262 = vmatmul.f32.vlgmr.msrb.gmra.mxu3 %v1098_v0  ;;  %v1517_v0 = vld [vmem:[#allocation2] sm:$0xff] }
 0x5c7   :  { %1495 = vmatpush.msrb.mxu3 %v1090_v35  ;;  %1474 = vmatpush.msrb.mxu2 %v1087_v36  ;;  %v1523_v35 = vld [vmem:[#allocation2 + $0x30] sm:$0xff]  ;;  %v1522_v36 = vld [vmem:[#allocation2 + $0x28] sm:$0xff] }
 0x5c9   :  { %1496 = vmatpush.msrb.mxu3 %v1089_v38  ;;  %v1521_v38 = vld [vmem:[#allocation2 + $0x20] sm:$0xff] }
 0x62f   :  { %v1123_v1 = vpop.f32.mrf.mxu2 }
 0x631   :  { %v1143_v2 = vpop.f32.mrf.mxu3 }
 0x632   :  { %v1281_v5 = vrot.slane %v1143_v2, 7  ;;  %v1510_v2 = vld [vmem:[%s3129_s6 + $0x48] sm:$0xff] }
 0x634   :  { %v1283_v45 = vsel %vm1282_vm0, %v1281_v5, %v1123_v1  ;;  %v1511_v1 = vld [vmem:[%s3129_s6 + $0x50] sm:$0xff]  ;;  %v1506_v5 = vld [vmem:[%s3129_s6 + $0x28] sm:$0xff] }
 0x637   :  { %v1163_v3 = vpop.f32.mrf.mxu2 }
 0x638   :  { %v1284_v11 = vrot.slane %v1163_v3, 6  ;;  %v1509_v3 = vld [vmem:[%s3129_s6 + $0x40] sm:$0xff] }
 0x639   :  { %v1183_v4 = vpop.f32.mrf.mxu3 }
 0x63a   :  { %v1287_v13 = vrot.slane %v1183_v4, 5  ;;  %v1286_v46 = vsel %vm1285_vm1, %v1284_v11, %v1283_v45  ;;  %v1508_v4 = vld [vmem:[%s3129_s6 + $0x38] sm:$0xff]  ;;  %v1505_v11 = vld [vmem:[%s3129_s6 + $0x20] sm:$0xff]  ;;  %v1503_v45 = vld [vmem:[%s3129_s6 + $0x10] sm:$0xff] }
 0x63c   :  { %v1289_v39 = vsel %vm1288_vm2, %v1287_v13, %v1286_v46  ;;  %v1502_v13 = vld [vmem:[%s3129_s6 + $0x8] sm:$0xff] }
 0x63f   :  { %v1203_v6 = vpop.f32.mrf.mxu2 }
 0x640   :  { %v1290_v53 = vrot.slane %v1203_v6, 4  ;;  %v1504_v6 = vld [vmem:[%s3129_s6 + $0x18] sm:$0xff] }
 0x641   :  { %v1223_v54 = vpop.f32.mrf.mxu3 }
 0x642   :  { %v1293_v63 = vrot.slane %v1223_v54, 3  ;;  %v1292_v41 = vsel %vm1291_vm3, %v1290_v53, %v1289_v39  ;;  %v1501_v54 = vld [vmem:[%s3129_s6] sm:$0xff] }
 0x644   :  { %v1295_v37 = vsel %vm1294_vm4, %v1293_v63, %v1292_v41 }
 0x647   :  { %v1243_v27 = vpop.f32.mrf.mxu2 }
 0x648   :  { %v1296_v58 = vrot.slane %v1243_v27, 2 }
 0x649   :  { %v1263_v60 = vpop.f32.mrf.mxu3 }
 0x64a   :  { %v1299_v40 = vrot.slane %v1263_v60, 1  ;;  %v1298_v59 = vsel %vm1297_vm5, %v1296_v58, %v1295_v37 }
 0x64c   :  { %v1301_v17 = vsel %vm1300_vm6, %v1299_v40, %v1298_v59 }
 0x64d   :  { %v1303_v20 = vsel %vm1272_vm8, %v1301_v17, -1e+30 }
 0x64e   :  { %v1305_v24 = vsel %vm1304_vm7, %v1303_v20, -inf }
 0x64f   :  { %1306 = vmax.xlane.f32.xlu0 %v1305_v24 }
 0x6c2   :  { %v1307_v29 = vpop.xlane.xlu0 %1306 }
 0x6c3   :  { %v1308_v61 = vsub.f32 %v1303_v20, %v1307_v29 }
 0x6c5   :  { %v1309_v16 = vmul.f32 1.442695, %v1308_v61 }
 0x6c7   :  { %1764 = vpow2.f32 %v1309_v16 }
 0x6cd   :  { %v1765_v56 = vpop.eup %1764 }
 0x6ce   :  { %v1311_v18 = vsel %vm1304_vm7, %v1765_v56, 0.0 }
 0x6cf   :  { %1312 = vadd.xlane.f32.xlu1 %v1311_v18 }
 0x742   :  { %v1313_v21 = vpop.xlane.xlu1 %1312 }
 0x743   :  { %1766 = vrcp.f32 %v1313_v21  ;;  %v1683_v21 = vld [vmem:[%s3131_s8] ss:$0 sm:$0xff] }
 0x749   :  { %v1767_v22 = vpop.eup %1766 }
 0x74a   :  { %v1315_v25 = vmul.f32 %v1767_v22, %v1765_v56 }
 0x74c   :  { %1316 = vst.msk [vmem:[%s3135_s12] sm:$0xff] %vm1304_vm7, %v1315_v25  ;;  %1667 = vmatmul.msk.f32.vlgmr.msra.gmra.mxu0 %vm1304_vm7, %v1315_v25  ;;  %v1318_v32 = vrot.slane %v1315_v25, 1  ;;  %v1319_v33 = vrot.slane %v1315_v25, 2  ;;  %v1320_v23 = vrot.slane %v1315_v25, 3  ;;  %v1321_v26 = vrot.slane %v1315_v25, 4 }
 0x74d   :  { %1533 = vmatpush.msra.mxu0 %v1532_v28  ;;  %v1322_v52 = vrot.slane %v1315_v25, 5  ;;  %v1323_v19 = vrot.slane %v1315_v25, 6  ;;  %v1324_v8 = vrot.slane %v1315_v25, 7 }
 0x74e   :  { %1668 = vmatmul.msk.f32.vlgmr.msra.gmra.mxu1 %vm1304_vm7, %v1318_v32  ;;  %1669 = vmatmul.msk.f32.vlgmr.msra.gmra.mxu2 %vm1304_vm7, %v1319_v33 }
 0x74f   :  { %1670 = vmatmul.msk.f32.vlgmr.msra.gmra.mxu3 %vm1304_vm7, %v1320_v23  ;;  %1534 = vmatpush.msra.mxu0 %v1531_v43 }
 0x750   :  { %1576 = vmatpush.msra.mxu1 %v1516_v34 }
 0x751   :  { %1535 = vmatpush.msra.mxu0 %v1530_v44 }
 0x752   :  { %1577 = vmatpush.msra.mxu1 %v1515_v48 }
 0x753   :  { %1536 = vmatpush.msra.mxu0 %v1529_v30 }
 0x754   :  { %1671 = vmatmul.msk.f32.vlgmr.msrb.gmra.mxu0 %vm1304_vm7, %v1321_v26  ;;  %1578 = vmatpush.msra.mxu1 %v1514_v50 }
 0x755   :  { %1537 = vmatpush.msra.mxu0 %v1528_v62 }
 0x756   :  { %1672 = vmatmul.msk.f32.vlgmr.msrb.gmra.mxu1 %vm1304_vm7, %v1322_v52  ;;  %1673 = vmatmul.msk.f32.vlgmr.msrb.gmra.mxu2 %vm1304_vm7, %v1323_v19 }
 0x757   :  { %1674 = vmatmul.msk.f32.vlgmr.msrb.gmra.mxu3 %vm1304_vm7, %v1324_v8  ;;  %1538 = vmatpush.msra.mxu0 %v1527_v7 }
 0x758   :  { %1579 = vmatpush.msra.mxu1 %v1513_v9 }
 0x759   :  { %1539 = vmatpush.msra.mxu0 %v1526_v12 }
 0x75a   :  { %1580 = vmatpush.msra.mxu1 %v1512_v14 }
 0x75b   :  { %1540 = vmatpush.msra.mxu0 %v1525_v15 }
 0x75c   :  { %1581 = vmatpush.msra.mxu1 %v1511_v1 }
 0x75d   :  { %1541 = vmatpush.msra.mxu0 %v1524_v42 }
 0x75e   :  { %1582 = vmatpush.msra.mxu1 %v1510_v2 }
 0x75f   :  { %1542 = vmatpush.msra.mxu0 %v1523_v35 }
 0x760   :  { %1583 = vmatpush.msra.mxu1 %v1509_v3 }
 0x761   :  { %1543 = vmatpush.msra.mxu0 %v1522_v36 }
 0x762   :  { %1584 = vmatpush.msra.mxu1 %v1508_v4 }
 0x763   :  { %1544 = vmatpush.msra.mxu0 %v1521_v38 }
 0x765   :  { %1545 = vmatpush.msra.mxu0 %v1520_v47 }
 0x767   :  { %1546 = vmatpush.msra.mxu0 %v1519_v49 }
 0x769   :  { %1547 = vmatpush.msra.mxu0 %v1518_v51 }
 0x76b   :  { %1548 = vmatpush.msra.mxu0 %v1517_v0 }
 0x76c   :  { %1549 = vmatmul.f32.vlgmr.msra.gmra.mxu0 %v3007_v10  ;;  %v1507_v10 = vld [vmem:[%s3129_s6 + $0x30] sm:$0xff] }
 0x76d   :  { %1585 = vmatpush.msra.mxu1 %v1507_v10 }
 0x76f   :  { %1586 = vmatpush.msra.mxu1 %v1506_v5 }
 0x771   :  { %1587 = vmatpush.msra.mxu1 %v1505_v11 }
 0x773   :  { %1588 = vmatpush.msra.mxu1 %v1504_v6 }
 0x775   :  { %1589 = vmatpush.msra.mxu1 %v1503_v45 }
 0x777   :  { %1590 = vmatpush.msra.mxu1 %v1502_v13 }
 0x779   :  { %1591 = vmatpush.msra.mxu1 %v1501_v54 }
 0x7c9   :  { %v1344_v46 = vpop.f32.mrf.mxu0 }
 0x7cb   :  { %v1366_v53 = vpop.f32.mrf.mxu1 }
 0x7cc   :  { %v1561_v55 = vrot.slane %v1366_v53, 7 }
 0x7ce   :  { %v1562_v27 = vsel %vm1282_vm0, %v1561_v55, %v1344_v46 }
 0x7d1   :  { %v1388_v39 = vpop.f32.mrf.mxu2  ;;  %v1432_v58 = vpop.f32.mrf.mxu0 }
 0x7d2   :  { %v1563_v63 = vrot.slane %v1388_v39, 6  ;;  %v1410_v41 = vpop.f32.mrf.mxu3  ;;  %v1567_v40 = vrot.slane %v1432_v58, 4 }
 0x7d3   :  { %v1565_v31 = vrot.slane %v1410_v41, 5  ;;  %v1454_v37 = vpop.f32.mrf.mxu1 }
 0x7d4   :  { %v1564_v57 = vsel %vm1285_vm1, %v1563_v63, %v1562_v27  ;;  %v1569_v59 = vrot.slane %v1454_v37, 3 }
 0x7d5   :  { %v1566_v60 = vsel %vm1288_vm2, %v1565_v31, %v1564_v57 }
 0x7d6   :  { %v1568_v17 = vsel %vm1291_vm3, %v1567_v40, %v1566_v60 }
 0x7d7   :  { %v1570_v61 = vsel %vm1294_vm4, %v1569_v59, %v1568_v17 }
 0x7d9   :  { %v1476_v20 = vpop.f32.mrf.mxu2 }
 0x7da   :  { %v1571_v24 = vrot.slane %v1476_v20, 2  ;;  %v1498_v29 = vpop.f32.mrf.mxu3 }
 0x7db   :  { %v1573_v16 = vrot.slane %v1498_v29, 1 }
 0x7dc   :  { %v1572_v56 = vsel %vm1297_vm5, %v1571_v24, %v1570_v61 }
 0x7dd   :  { %v1574_v18 = vsel %vm1300_vm6, %v1573_v16, %v1572_v56 }
 0x7de   :  { %1592 = vmatmul.f32.vlgmr.msra.gmra.mxu1 %v1574_v18 }
 0x7e9   :  { %v1550_v22 = vpop.f32.mrf.mxu0 }
 0x85b   :  { %v1593_v25 = vpop.f32.mrf.mxu1 }
 0x85c   :  { %v1594_v28 = vadd.f32 %v1593_v25, %v1550_v22 }
 0x85e   :  { %v1600_v32 = vadd.f32 %v1683_v21, %v1594_v28 }
 0x860   :  { %1768 = vtanh.f32 %v1600_v32 }
 0x866   :  { %v1769_v33 = vpop.eup %1768 }
 0x867   :  { %1602 = vst [vmem:[%s3134_s11] sm:$0xff] %v1769_v33 }
 0x868   :  { %1619 = vsyncpa [#allocation3], 1 }

</bundles_post_ra>
